<compile_context>
chip_gen: v7x
topology: tpu7x:2x2x1
jax: 0.10.0
libtpu: 0.0.40
codegen_flags: <defaults>
</compile_context>

<pallas_src>
import functools

import numpy as np
import jax
import jax.numpy as jnp
from jax.experimental import pallas as pl
from jax.experimental.pallas import tpu as pltpu


# ----------------------------------------------------------------------------
# Fused whole-network kernel
# ----------------------------------------------------------------------------
def _fused_forward_kernel(*refs, num_conv_layers, conv_ks, h_last):
    """refs = [A0, (selh, msum, bias_tile) x L, e_sel, wd_stack, b_dense, out]."""
    out_ref = refs[-1]
    a = refs[0][...].astype(jnp.float32)          # [N*H, W*C] activation

    idx = 1
    for layer in range(num_conv_layers):
        selh_ref, msum_ref, bias_ref = refs[idx], refs[idx + 1], refs[idx + 2]
        idx += 3
        acc = None
        for kh in range(conv_ks[layer]):
            rows = jnp.dot(selh_ref[kh], a, preferred_element_type=jnp.float32)
            term = jnp.dot(rows, msum_ref[kh], preferred_element_type=jnp.float32)
            acc = term if acc is None else acc + term
        a = jnp.maximum(acc + bias_ref[...], 0.0)                 # bias + ReLU fused

    e_ref, wd_ref, bd_ref = refs[idx], refs[idx + 1], refs[idx + 2]
    logits = None
    for h in range(h_last):
        rows = jnp.dot(e_ref[h], a, preferred_element_type=jnp.float32)       # [N, W*C]
        term = jnp.dot(rows, wd_ref[h], preferred_element_type=jnp.float32)   # [N, 10]
        logits = term if logits is None else logits + term
    out_ref[...] = logits + bd_ref[...]


# ----------------------------------------------------------------------------
# Host-side operand construction (constant-folded under jit; params closed over)
# ----------------------------------------------------------------------------
def _conv_out(sz, k, s, p):
    return (sz + 2 * p - k) // s + 1


def _sel_h(n_batch, h_in, h_out, kh, stride, pad):
    sel = np.zeros((h_out, h_in), np.float32)
    for ho in range(h_out):
        h = stride * ho + kh - pad
        if 0 <= h < h_in:
            sel[ho, h] = 1.0
    return np.kron(np.eye(n_batch, dtype=np.float32), sel)        # [N*Ho, N*Hin]


def _sel_w(w_in, w_out, kw, stride, pad):
    sel = np.zeros((w_in, w_out), np.float32)
    for wo in range(w_out):
        w = stride * wo + kw - pad
        if 0 <= w < w_in:
            sel[w, wo] = 1.0
    return sel


def _conv_layer_operands(w, b, stride, pad, n_batch, h_in, w_in):
    """Fold stride/padding selection and conv weights into per-kh matmul operands."""
    c_out, c_in, k, _ = w.shape
    h_out = _conv_out(h_in, k, stride, pad)
    w_out = _conv_out(w_in, k, stride, pad)

    selh = jnp.asarray(
        np.stack([_sel_h(n_batch, h_in, h_out, kh, stride, pad) for kh in range(k)]))

    msum = []
    for kh in range(k):
        m = jnp.zeros((w_in * c_in, w_out * c_out), jnp.float32)
        for kw in range(k):
            sw = jnp.asarray(_sel_w(w_in, w_out, kw, stride, pad))   # [Win, Wo]
            wtap = w[:, :, kh, kw].T.astype(jnp.float32)             # [Cin, Cout]
            m = m + jnp.einsum("wx,cy->wcxy", sw, wtap).reshape(
                w_in * c_in, w_out * c_out)
        msum.append(m)
    msum = jnp.stack(msum)                                           # [K, Win*Cin, Wo*Cout]

    bias_tile = jnp.tile(b.astype(jnp.float32), (w_out,)).reshape(1, w_out * c_out)
    return (selh, msum, bias_tile), (h_out, w_out, c_out, k)


def _dense_operands(wd, bd, n_batch, h, w, c):
    """PyTorch flatten order (c, h, w) folded into per-output-row dense weights."""
    e = np.zeros((h, n_batch, n_batch * h), np.float32)
    for hh in range(h):
        for n in range(n_batch):
            e[hh, n, n * h + hh] = 1.0
    wd_stack = jnp.transpose(wd.reshape(10, c, h, w), (2, 3, 1, 0)).reshape(h, w * c, 10)
    return (jnp.asarray(e), wd_stack.astype(jnp.float32),
            bd.astype(jnp.float32).reshape(1, 10))


def _padded_vmem_bytes(arr):
    """(8,128)-padded VMEM footprint of one operand."""
    shape = tuple(arr.shape) if arr.ndim >= 2 else (1,) + tuple(arr.shape)
    lead = int(np.prod(shape[:-2])) if len(shape) > 2 else 1
    sub = -(-int(shape[-2]) // 8) * 8
    lane = -(-int(shape[-1]) // 128) * 128
    return lead * sub * lane * arr.dtype.itemsize


# ----------------------------------------------------------------------------
# ChildNetwork parameters + forward
# ----------------------------------------------------------------------------
def init_child_network(action, key):
    """Deterministic parameter init (PyTorch-like uniform(-1/sqrt(fan_in), ...))."""
    params = {"convs": []}
    in_c = 3
    dense_input_pixels = 32 * 32
    for dct in action:
        c_out = int(dct["no_of_filters"])
        k = int(dct["kernel_size"])
        s = int(dct["stride"])
        key, kw_, kb_ = jax.random.split(key, 3)
        fan_in = in_c * k * k
        bound = 1.0 / np.sqrt(fan_in)
        w = jax.random.uniform(kw_, (c_out, in_c, k, k), jnp.float32, -bound, bound)
        b = jax.random.uniform(kb_, (c_out,), jnp.float32, -bound, bound)
        params["convs"].append({"w": w, "b": b, "stride": s, "pad": int((k - 1) / 2)})
        in_c = c_out
        dense_input_pixels = max(1, int(dense_input_pixels / (s * s)))

    dense_in = dense_input_pixels * int(action[-1]["no_of_filters"])
    key, kw_, kb_ = jax.random.split(key, 3)
    bound = 1.0 / np.sqrt(dense_in)
    params["dense_w"] = jax.random.uniform(kw_, (10, dense_in), jnp.float32, -bound, bound)
    params["dense_b"] = jax.random.uniform(kb_, (10,), jnp.float32, -bound, bound)
    params["dense_in"] = dense_in
    return params


def child_network_forward(params, x):
    """x: [N, 3, 32, 32] (NCHW, as in PyTorch) -> logits [N, 10] in ONE pallas_call."""
    n_batch, c_in, h_in, w_in = x.shape
    # Single tiny input-layout prep: NCHW -> (n*h, w*c) 2-D activation.
    a0 = jnp.transpose(x, (0, 2, 3, 1)).reshape(n_batch * h_in, w_in * c_in)
    a0 = a0.astype(jnp.float32)

    operands = [a0]
    conv_ks = []
    h, w, c = h_in, w_in, c_in
    for layer in params["convs"]:
        (selh, msum, bias_tile), (h, w, c, k) = _conv_layer_operands(
            layer["w"], layer["b"], layer["stride"], layer["pad"], n_batch, h, w)
        operands += [selh, msum, bias_tile]
        conv_ks.append(k)

    # The reference module sizes the dense layer with int(pixels/(s*s)); that only
    # matches the true conv output when strides divide evenly (true for this action).
    # TODO(synk): generalize if NAS actions with non-dividing strides are needed.
    assert params["dense_in"] == h * w * c, (params["dense_in"], h, w, c)

    e_sel, wd_stack, bd = _dense_operands(params["dense_w"], params["dense_b"],
                                          n_batch, h, w, c)
    operands += [e_sel, wd_stack, bd]

    # VMEM limit computed from actual padded operand footprint + headroom (review item).
    vmem_bytes = sum(_padded_vmem_bytes(a) for a in operands)
    vmem_bytes += (-(-n_batch // 8) * 8) * 128 * 4          # output tile
    vmem_limit = int(min(2 * vmem_bytes + (16 << 20), 64 << 20))

    kernel = functools.partial(
        _fused_forward_kernel,
        num_conv_layers=len(params["convs"]),
        conv_ks=tuple(conv_ks),
        h_last=h,
    )
    return pl.pallas_call(
        kernel,
        out_shape=jax.ShapeDtypeStruct((n_batch, 10), jnp.float32),
        in_specs=[pl.BlockSpec(memory_space=pltpu.MemorySpace.VMEM)] * len(operands),
        out_specs=pl.BlockSpec(memory_space=pltpu.MemorySpace.VMEM),
        compiler_params=pltpu.CompilerParams(vmem_limit_bytes=vmem_limit),
    )(*operands)


# ----------------------------------------------------------------------------
# Pure-JAX reference of the PyTorch module (for a numeric sanity check)
# ----------------------------------------------------------------------------
def reference_forward(params, x):
    y = x
    for layer in params["convs"]:
        y = jax.lax.conv_general_dilated(
            y, layer["w"], window_strides=(layer["stride"],) * 2,
            padding=[(layer["pad"], layer["pad"])] * 2,
            dimension_numbers=("NCHW", "OIHW", "NCHW"))
        y = jnp.maximum(y + layer["b"].reshape(1, -1, 1, 1), 0.0)
    y = y.reshape(y.shape[0], params["dense_in"])        # torch .view(-1, C*H*W) order
    return y @ params["dense_w"].T + params["dense_b"]


if __name__ == "__main__":
    # A small fixed "action" (NAS decision) defining the child network.
    action = [
        {"no_of_filters": 8, "kernel_size": 3, "stride": 2},
        {"no_of_filters": 16, "kernel_size": 3, "stride": 2},
    ]

    key = jax.random.PRNGKey(0)
    key, pkey, xkey = jax.random.split(key, 3)
    params = init_child_network(action, pkey)

    # The module hard-codes 3-channel, 32x32 spatial input (dense_input_pixels = 32*32).
    x = jax.random.normal(xkey, (2, 3, 32, 32), jnp.float32)

    fwd = jax.jit(lambda xx: child_network_forward(params, xx))
    logits = jax.block_until_ready(fwd(x))
    assert logits.shape == (2, 10), logits.shape

    ref = jax.block_until_ready(jax.jit(lambda xx: reference_forward(params, xx))(x))
    if not jnp.allclose(logits, ref, rtol=2e-2, atol=2e-2):
        raise AssertionError(
            f"kernel/reference mismatch, max abs err {float(jnp.max(jnp.abs(logits - ref)))}")
    print("KERNEL_OK")
</pallas_src>

<mosaic_0001>
module attributes {stable_mosaic.version = 11 : i64} {
  func.func @_fused_forward_kernel(%arg0: memref<64x96xf32, #tpu.memory_space<vmem>>, %arg1: memref<3x32x64xf32, #tpu.memory_space<vmem>>, %arg2: memref<3x96x128xf32, #tpu.memory_space<vmem>>, %arg3: memref<1x128xf32, #tpu.memory_space<vmem>>, %arg4: memref<3x16x32xf32, #tpu.memory_space<vmem>>, %arg5: memref<3x128x128xf32, #tpu.memory_space<vmem>>, %arg6: memref<1x128xf32, #tpu.memory_space<vmem>>, %arg7: memref<8x2x16xf32, #tpu.memory_space<vmem>>, %arg8: memref<8x128x10xf32, #tpu.memory_space<vmem>>, %arg9: memref<1x10xf32, #tpu.memory_space<vmem>>, %arg10: memref<2x10xf32, #tpu.memory_space<vmem>>) attributes {dimension_semantics = [], scalar_prefetch = 0 : i64, scratch_operands = 0 : i64, tpu.core_type = #tpu.core_type<tc>} {
    %c0 = arith.constant 0 : index
    %c0_0 = arith.constant 0 : index
    %0 = vector.load %arg0[%c0, %c0_0] : memref<64x96xf32, #tpu.memory_space<vmem>>, vector<64x96xf32>
    %c0_1 = arith.constant 0 : index
    %c0_2 = arith.constant 0 : index
    %c0_3 = arith.constant 0 : index
    %1 = vector.load %arg1[%c0_1, %c0_2, %c0_3] : memref<3x32x64xf32, #tpu.memory_space<vmem>>, vector<1x32x64xf32>
    %2 = vector.shape_cast %1 : vector<1x32x64xf32> to vector<32x64xf32>
    %cst = arith.constant dense<0.000000e+00> : vector<32x96xf32>
    %3 = tpu.matmul %2, %0, %cst {dimension_numbers = #tpu.dot_dimension_numbers<[1], [0], [0], [1], [0, 0, 1, 1], [], []>} : vector<32x64xf32>, vector<64x96xf32>, vector<32x96xf32> -> vector<32x96xf32>
    %c0_4 = arith.constant 0 : index
    %c0_5 = arith.constant 0 : index
    %c0_6 = arith.constant 0 : index
    %4 = vector.load %arg2[%c0_4, %c0_5, %c0_6] : memref<3x96x128xf32, #tpu.memory_space<vmem>>, vector<1x96x128xf32>
    %5 = vector.shape_cast %4 : vector<1x96x128xf32> to vector<96x128xf32>
    %cst_7 = arith.constant dense<0.000000e+00> : vector<32x128xf32>
    %6 = tpu.matmul %3, %5, %cst_7 {dimension_numbers = #tpu.dot_dimension_numbers<[1], [0], [0], [1], [0, 0, 1, 1], [], []>} : vector<32x96xf32>, vector<96x128xf32>, vector<32x128xf32> -> vector<32x128xf32>
    %c1 = arith.constant 1 : index
    %c0_8 = arith.constant 0 : index
    %c0_9 = arith.constant 0 : index
    %7 = vector.load %arg1[%c1, %c0_8, %c0_9] : memref<3x32x64xf32, #tpu.memory_space<vmem>>, vector<1x32x64xf32>
    %8 = vector.shape_cast %7 : vector<1x32x64xf32> to vector<32x64xf32>
    %cst_10 = arith.constant dense<0.000000e+00> : vector<32x96xf32>
    %9 = tpu.matmul %8, %0, %cst_10 {dimension_numbers = #tpu.dot_dimension_numbers<[1], [0], [0], [1], [0, 0, 1, 1], [], []>} : vector<32x64xf32>, vector<64x96xf32>, vector<32x96xf32> -> vector<32x96xf32>
    %c1_11 = arith.constant 1 : index
    %c0_12 = arith.constant 0 : index
    %c0_13 = arith.constant 0 : index
    %10 = vector.load %arg2[%c1_11, %c0_12, %c0_13] : memref<3x96x128xf32, #tpu.memory_space<vmem>>, vector<1x96x128xf32>
    %11 = vector.shape_cast %10 : vector<1x96x128xf32> to vector<96x128xf32>
    %cst_14 = arith.constant dense<0.000000e+00> : vector<32x128xf32>
    %12 = tpu.matmul %9, %11, %cst_14 {dimension_numbers = #tpu.dot_dimension_numbers<[1], [0], [0], [1], [0, 0, 1, 1], [], []>} : vector<32x96xf32>, vector<96x128xf32>, vector<32x128xf32> -> vector<32x128xf32>
    %13 = arith.addf %6, %12 : vector<32x128xf32>
    %c2 = arith.constant 2 : index
    %c0_15 = arith.constant 0 : index
    %c0_16 = arith.constant 0 : index
    %14 = vector.load %arg1[%c2, %c0_15, %c0_16] : memref<3x32x64xf32, #tpu.memory_space<vmem>>, vector<1x32x64xf32>
    %15 = vector.shape_cast %14 : vector<1x32x64xf32> to vector<32x64xf32>
    %cst_17 = arith.constant dense<0.000000e+00> : vector<32x96xf32>
    %16 = tpu.matmul %15, %0, %cst_17 {dimension_numbers = #tpu.dot_dimension_numbers<[1], [0], [0], [1], [0, 0, 1, 1], [], []>} : vector<32x64xf32>, vector<64x96xf32>, vector<32x96xf32> -> vector<32x96xf32>
    %c2_18 = arith.constant 2 : index
    %c0_19 = arith.constant 0 : index
    %c0_20 = arith.constant 0 : index
    %17 = vector.load %arg2[%c2_18, %c0_19, %c0_20] : memref<3x96x128xf32, #tpu.memory_space<vmem>>, vector<1x96x128xf32>
    %18 = vector.shape_cast %17 : vector<1x96x128xf32> to vector<96x128xf32>
    %cst_21 = arith.constant dense<0.000000e+00> : vector<32x128xf32>
    %19 = tpu.matmul %16, %18, %cst_21 {dimension_numbers = #tpu.dot_dimension_numbers<[1], [0], [0], [1], [0, 0, 1, 1], [], []>} : vector<32x96xf32>, vector<96x128xf32>, vector<32x128xf32> -> vector<32x128xf32>
    %20 = arith.addf %13, %19 : vector<32x128xf32>
    %c0_22 = arith.constant 0 : index
    %c0_23 = arith.constant 0 : index
    %21 = vector.load %arg3[%c0_22, %c0_23] : memref<1x128xf32, #tpu.memory_space<vmem>>, vector<1x128xf32>
    %22 = vector.broadcast %21 : vector<1x128xf32> to vector<32x128xf32>
    %23 = arith.addf %20, %22 : vector<32x128xf32>
    %cst_24 = arith.constant 0.000000e+00 : f32
    %24 = vector.broadcast %cst_24 : f32 to vector<32x128xf32>
    %25 = arith.maximumf %23, %24 : vector<32x128xf32>
    %c0_25 = arith.constant 0 : index
    %c0_26 = arith.constant 0 : index
    %c0_27 = arith.constant 0 : index
    %26 = vector.load %arg4[%c0_25, %c0_26, %c0_27] : memref<3x16x32xf32, #tpu.memory_space<vmem>>, vector<1x16x32xf32>
    %27 = vector.shape_cast %26 : vector<1x16x32xf32> to vector<16x32xf32>
    %cst_28 = arith.constant dense<0.000000e+00> : vector<16x128xf32>
    %28 = tpu.matmul %27, %25, %cst_28 {dimension_numbers = #tpu.dot_dimension_numbers<[1], [0], [0], [1], [0, 0, 1, 1], [], []>} : vector<16x32xf32>, vector<32x128xf32>, vector<16x128xf32> -> vector<16x128xf32>
    %c0_29 = arith.constant 0 : index
    %c0_30 = arith.constant 0 : index
    %c0_31 = arith.constant 0 : index
    %29 = vector.load %arg5[%c0_29, %c0_30, %c0_31] : memref<3x128x128xf32, #tpu.memory_space<vmem>>, vector<1x128x128xf32>
    %30 = vector.shape_cast %29 : vector<1x128x128xf32> to vector<128x128xf32>
    %cst_32 = arith.constant dense<0.000000e+00> : vector<16x128xf32>
    %31 = tpu.matmul %28, %30, %cst_32 {dimension_numbers = #tpu.dot_dimension_numbers<[1], [0], [0], [1], [0, 0, 1, 1], [], []>} : vector<16x128xf32>, vector<128x128xf32>, vector<16x128xf32> -> vector<16x128xf32>
    %c1_33 = arith.constant 1 : index
    %c0_34 = arith.constant 0 : index
    %c0_35 = arith.constant 0 : index
    %32 = vector.load %arg4[%c1_33, %c0_34, %c0_35] : memref<3x16x32xf32, #tpu.memory_space<vmem>>, vector<1x16x32xf32>
    %33 = vector.shape_cast %32 : vector<1x16x32xf32> to vector<16x32xf32>
    %cst_36 = arith.constant dense<0.000000e+00> : vector<16x128xf32>
    %34 = tpu.matmul %33, %25, %cst_36 {dimension_numbers = #tpu.dot_dimension_numbers<[1], [0], [0], [1], [0, 0, 1, 1], [], []>} : vector<16x32xf32>, vector<32x128xf32>, vector<16x128xf32> -> vector<16x128xf32>
    %c1_37 = arith.constant 1 : index
    %c0_38 = arith.constant 0 : index
    %c0_39 = arith.constant 0 : index
    %35 = vector.load %arg5[%c1_37, %c0_38, %c0_39] : memref<3x128x128xf32, #tpu.memory_space<vmem>>, vector<1x128x128xf32>
    %36 = vector.shape_cast %35 : vector<1x128x128xf32> to vector<128x128xf32>
    %cst_40 = arith.constant dense<0.000000e+00> : vector<16x128xf32>
    %37 = tpu.matmul %34, %36, %cst_40 {dimension_numbers = #tpu.dot_dimension_numbers<[1], [0], [0], [1], [0, 0, 1, 1], [], []>} : vector<16x128xf32>, vector<128x128xf32>, vector<16x128xf32> -> vector<16x128xf32>
    %38 = arith.addf %31, %37 : vector<16x128xf32>
    %c2_41 = arith.constant 2 : index
    %c0_42 = arith.constant 0 : index
    %c0_43 = arith.constant 0 : index
    %39 = vector.load %arg4[%c2_41, %c0_42, %c0_43] : memref<3x16x32xf32, #tpu.memory_space<vmem>>, vector<1x16x32xf32>
    %40 = vector.shape_cast %39 : vector<1x16x32xf32> to vector<16x32xf32>
    %cst_44 = arith.constant dense<0.000000e+00> : vector<16x128xf32>
    %41 = tpu.matmul %40, %25, %cst_44 {dimension_numbers = #tpu.dot_dimension_numbers<[1], [0], [0], [1], [0, 0, 1, 1], [], []>} : vector<16x32xf32>, vector<32x128xf32>, vector<16x128xf32> -> vector<16x128xf32>
    %c2_45 = arith.constant 2 : index
    %c0_46 = arith.constant 0 : index
    %c0_47 = arith.constant 0 : index
    %42 = vector.load %arg5[%c2_45, %c0_46, %c0_47] : memref<3x128x128xf32, #tpu.memory_space<vmem>>, vector<1x128x128xf32>
    %43 = vector.shape_cast %42 : vector<1x128x128xf32> to vector<128x128xf32>
    %cst_48 = arith.constant dense<0.000000e+00> : vector<16x128xf32>
    %44 = tpu.matmul %41, %43, %cst_48 {dimension_numbers = #tpu.dot_dimension_numbers<[1], [0], [0], [1], [0, 0, 1, 1], [], []>} : vector<16x128xf32>, vector<128x128xf32>, vector<16x128xf32> -> vector<16x128xf32>
    %45 = arith.addf %38, %44 : vector<16x128xf32>
    %c0_49 = arith.constant 0 : index
    %c0_50 = arith.constant 0 : index
    %46 = vector.load %arg6[%c0_49, %c0_50] : memref<1x128xf32, #tpu.memory_space<vmem>>, vector<1x128xf32>
    %47 = vector.broadcast %46 : vector<1x128xf32> to vector<16x128xf32>
    %48 = arith.addf %45, %47 : vector<16x128xf32>
    %cst_51 = arith.constant 0.000000e+00 : f32
    %49 = vector.broadcast %cst_51 : f32 to vector<16x128xf32>
    %50 = arith.maximumf %48, %49 : vector<16x128xf32>
    %c0_52 = arith.constant 0 : index
    %c0_53 = arith.constant 0 : index
    %c0_54 = arith.constant 0 : index
    %51 = vector.load %arg7[%c0_52, %c0_53, %c0_54] : memref<8x2x16xf32, #tpu.memory_space<vmem>>, vector<1x2x16xf32>
    %52 = vector.shape_cast %51 : vector<1x2x16xf32> to vector<2x16xf32>
    %cst_55 = arith.constant dense<0.000000e+00> : vector<2x128xf32>
    %53 = tpu.matmul %52, %50, %cst_55 {dimension_numbers = #tpu.dot_dimension_numbers<[1], [0], [0], [1], [0, 0, 1, 1], [], []>} : vector<2x16xf32>, vector<16x128xf32>, vector<2x128xf32> -> vector<2x128xf32>
    %c0_56 = arith.constant 0 : index
    %c0_57 = arith.constant 0 : index
    %c0_58 = arith.constant 0 : index
    %54 = vector.load %arg8[%c0_56, %c0_57, %c0_58] : memref<8x128x10xf32, #tpu.memory_space<vmem>>, vector<1x128x10xf32>
    %55 = vector.shape_cast %54 : vector<1x128x10xf32> to vector<128x10xf32>
    %cst_59 = arith.constant dense<0.000000e+00> : vector<2x10xf32>
    %56 = tpu.matmul %53, %55, %cst_59 {dimension_numbers = #tpu.dot_dimension_numbers<[1], [0], [0], [1], [0, 0, 1, 1], [], []>} : vector<2x128xf32>, vector<128x10xf32>, vector<2x10xf32> -> vector<2x10xf32>
    %c1_60 = arith.constant 1 : index
    %c0_61 = arith.constant 0 : index
    %c0_62 = arith.constant 0 : index
    %57 = vector.load %arg7[%c1_60, %c0_61, %c0_62] : memref<8x2x16xf32, #tpu.memory_space<vmem>>, vector<1x2x16xf32>
    %58 = vector.shape_cast %57 : vector<1x2x16xf32> to vector<2x16xf32>
    %cst_63 = arith.constant dense<0.000000e+00> : vector<2x128xf32>
    %59 = tpu.matmul %58, %50, %cst_63 {dimension_numbers = #tpu.dot_dimension_numbers<[1], [0], [0], [1], [0, 0, 1, 1], [], []>} : vector<2x16xf32>, vector<16x128xf32>, vector<2x128xf32> -> vector<2x128xf32>
    %c1_64 = arith.constant 1 : index
    %c0_65 = arith.constant 0 : index
    %c0_66 = arith.constant 0 : index
    %60 = vector.load %arg8[%c1_64, %c0_65, %c0_66] : memref<8x128x10xf32, #tpu.memory_space<vmem>>, vector<1x128x10xf32>
    %61 = vector.shape_cast %60 : vector<1x128x10xf32> to vector<128x10xf32>
    %cst_67 = arith.constant dense<0.000000e+00> : vector<2x10xf32>
    %62 = tpu.matmul %59, %61, %cst_67 {dimension_numbers = #tpu.dot_dimension_numbers<[1], [0], [0], [1], [0, 0, 1, 1], [], []>} : vector<2x128xf32>, vector<128x10xf32>, vector<2x10xf32> -> vector<2x10xf32>
    %63 = arith.addf %56, %62 : vector<2x10xf32>
    %c2_68 = arith.constant 2 : index
    %c0_69 = arith.constant 0 : index
    %c0_70 = arith.constant 0 : index
    %64 = vector.load %arg7[%c2_68, %c0_69, %c0_70] : memref<8x2x16xf32, #tpu.memory_space<vmem>>, vector<1x2x16xf32>
    %65 = vector.shape_cast %64 : vector<1x2x16xf32> to vector<2x16xf32>
    %cst_71 = arith.constant dense<0.000000e+00> : vector<2x128xf32>
    %66 = tpu.matmul %65, %50, %cst_71 {dimension_numbers = #tpu.dot_dimension_numbers<[1], [0], [0], [1], [0, 0, 1, 1], [], []>} : vector<2x16xf32>, vector<16x128xf32>, vector<2x128xf32> -> vector<2x128xf32>
    %c2_72 = arith.constant 2 : index
    %c0_73 = arith.constant 0 : index
    %c0_74 = arith.constant 0 : index
    %67 = vector.load %arg8[%c2_72, %c0_73, %c0_74] : memref<8x128x10xf32, #tpu.memory_space<vmem>>, vector<1x128x10xf32>
    %68 = vector.shape_cast %67 : vector<1x128x10xf32> to vector<128x10xf32>
    %cst_75 = arith.constant dense<0.000000e+00> : vector<2x10xf32>
    %69 = tpu.matmul %66, %68, %cst_75 {dimension_numbers = #tpu.dot_dimension_numbers<[1], [0], [0], [1], [0, 0, 1, 1], [], []>} : vector<2x128xf32>, vector<128x10xf32>, vector<2x10xf32> -> vector<2x10xf32>
    %70 = arith.addf %63, %69 : vector<2x10xf32>
    %c3 = arith.constant 3 : index
    %c0_76 = arith.constant 0 : index
    %c0_77 = arith.constant 0 : index
    %71 = vector.load %arg7[%c3, %c0_76, %c0_77] : memref<8x2x16xf32, #tpu.memory_space<vmem>>, vector<1x2x16xf32>
    %72 = vector.shape_cast %71 : vector<1x2x16xf32> to vector<2x16xf32>
    %cst_78 = arith.constant dense<0.000000e+00> : vector<2x128xf32>
    %73 = tpu.matmul %72, %50, %cst_78 {dimension_numbers = #tpu.dot_dimension_numbers<[1], [0], [0], [1], [0, 0, 1, 1], [], []>} : vector<2x16xf32>, vector<16x128xf32>, vector<2x128xf32> -> vector<2x128xf32>
    %c3_79 = arith.constant 3 : index
    %c0_80 = arith.constant 0 : index
    %c0_81 = arith.constant 0 : index
    %74 = vector.load %arg8[%c3_79, %c0_80, %c0_81] : memref<8x128x10xf32, #tpu.memory_space<vmem>>, vector<1x128x10xf32>
    %75 = vector.shape_cast %74 : vector<1x128x10xf32> to vector<128x10xf32>
    %cst_82 = arith.constant dense<0.000000e+00> : vector<2x10xf32>
    %76 = tpu.matmul %73, %75, %cst_82 {dimension_numbers = #tpu.dot_dimension_numbers<[1], [0], [0], [1], [0, 0, 1, 1], [], []>} : vector<2x128xf32>, vector<128x10xf32>, vector<2x10xf32> -> vector<2x10xf32>
    %77 = arith.addf %70, %76 : vector<2x10xf32>
    %c4 = arith.constant 4 : index
    %c0_83 = arith.constant 0 : index
    %c0_84 = arith.constant 0 : index
    %78 = vector.load %arg7[%c4, %c0_83, %c0_84] : memref<8x2x16xf32, #tpu.memory_space<vmem>>, vector<1x2x16xf32>
    %79 = vector.shape_cast %78 : vector<1x2x16xf32> to vector<2x16xf32>
    %cst_85 = arith.constant dense<0.000000e+00> : vector<2x128xf32>
    %80 = tpu.matmul %79, %50, %cst_85 {dimension_numbers = #tpu.dot_dimension_numbers<[1], [0], [0], [1], [0, 0, 1, 1], [], []>} : vector<2x16xf32>, vector<16x128xf32>, vector<2x128xf32> -> vector<2x128xf32>
    %c4_86 = arith.constant 4 : index
    %c0_87 = arith.constant 0 : index
    %c0_88 = arith.constant 0 : index
    %81 = vector.load %arg8[%c4_86, %c0_87, %c0_88] : memref<8x128x10xf32, #tpu.memory_space<vmem>>, vector<1x128x10xf32>
    %82 = vector.shape_cast %81 : vector<1x128x10xf32> to vector<128x10xf32>
    %cst_89 = arith.constant dense<0.000000e+00> : vector<2x10xf32>
    %83 = tpu.matmul %80, %82, %cst_89 {dimension_numbers = #tpu.dot_dimension_numbers<[1], [0], [0], [1], [0, 0, 1, 1], [], []>} : vector<2x128xf32>, vector<128x10xf32>, vector<2x10xf32> -> vector<2x10xf32>
    %84 = arith.addf %77, %83 : vector<2x10xf32>
    %c5 = arith.constant 5 : index
    %c0_90 = arith.constant 0 : index
    %c0_91 = arith.constant 0 : index
    %85 = vector.load %arg7[%c5, %c0_90, %c0_91] : memref<8x2x16xf32, #tpu.memory_space<vmem>>, vector<1x2x16xf32>
    %86 = vector.shape_cast %85 : vector<1x2x16xf32> to vector<2x16xf32>
    %cst_92 = arith.constant dense<0.000000e+00> : vector<2x128xf32>
    %87 = tpu.matmul %86, %50, %cst_92 {dimension_numbers = #tpu.dot_dimension_numbers<[1], [0], [0], [1], [0, 0, 1, 1], [], []>} : vector<2x16xf32>, vector<16x128xf32>, vector<2x128xf32> -> vector<2x128xf32>
    %c5_93 = arith.constant 5 : index
    %c0_94 = arith.constant 0 : index
    %c0_95 = arith.constant 0 : index
    %88 = vector.load %arg8[%c5_93, %c0_94, %c0_95] : memref<8x128x10xf32, #tpu.memory_space<vmem>>, vector<1x128x10xf32>
    %89 = vector.shape_cast %88 : vector<1x128x10xf32> to vector<128x10xf32>
    %cst_96 = arith.constant dense<0.000000e+00> : vector<2x10xf32>
    %90 = tpu.matmul %87, %89, %cst_96 {dimension_numbers = #tpu.dot_dimension_numbers<[1], [0], [0], [1], [0, 0, 1, 1], [], []>} : vector<2x128xf32>, vector<128x10xf32>, vector<2x10xf32> -> vector<2x10xf32>
    %91 = arith.addf %84, %90 : vector<2x10xf32>
    %c6 = arith.constant 6 : index
    %c0_97 = arith.constant 0 : index
    %c0_98 = arith.constant 0 : index
    %92 = vector.load %arg7[%c6, %c0_97, %c0_98] : memref<8x2x16xf32, #tpu.memory_space<vmem>>, vector<1x2x16xf32>
    %93 = vector.shape_cast %92 : vector<1x2x16xf32> to vector<2x16xf32>
    %cst_99 = arith.constant dense<0.000000e+00> : vector<2x128xf32>
    %94 = tpu.matmul %93, %50, %cst_99 {dimension_numbers = #tpu.dot_dimension_numbers<[1], [0], [0], [1], [0, 0, 1, 1], [], []>} : vector<2x16xf32>, vector<16x128xf32>, vector<2x128xf32> -> vector<2x128xf32>
    %c6_100 = arith.constant 6 : index
    %c0_101 = arith.constant 0 : index
    %c0_102 = arith.constant 0 : index
    %95 = vector.load %arg8[%c6_100, %c0_101, %c0_102] : memref<8x128x10xf32, #tpu.memory_space<vmem>>, vector<1x128x10xf32>
    %96 = vector.shape_cast %95 : vector<1x128x10xf32> to vector<128x10xf32>
    %cst_103 = arith.constant dense<0.000000e+00> : vector<2x10xf32>
    %97 = tpu.matmul %94, %96, %cst_103 {dimension_numbers = #tpu.dot_dimension_numbers<[1], [0], [0], [1], [0, 0, 1, 1], [], []>} : vector<2x128xf32>, vector<128x10xf32>, vector<2x10xf32> -> vector<2x10xf32>
    %98 = arith.addf %91, %97 : vector<2x10xf32>
    %c7 = arith.constant 7 : index
    %c0_104 = arith.constant 0 : index
    %c0_105 = arith.constant 0 : index
    %99 = vector.load %arg7[%c7, %c0_104, %c0_105] : memref<8x2x16xf32, #tpu.memory_space<vmem>>, vector<1x2x16xf32>
    %100 = vector.shape_cast %99 : vector<1x2x16xf32> to vector<2x16xf32>
    %cst_106 = arith.constant dense<0.000000e+00> : vector<2x128xf32>
    %101 = tpu.matmul %100, %50, %cst_106 {dimension_numbers = #tpu.dot_dimension_numbers<[1], [0], [0], [1], [0, 0, 1, 1], [], []>} : vector<2x16xf32>, vector<16x128xf32>, vector<2x128xf32> -> vector<2x128xf32>
    %c7_107 = arith.constant 7 : index
    %c0_108 = arith.constant 0 : index
    %c0_109 = arith.constant 0 : index
    %102 = vector.load %arg8[%c7_107, %c0_108, %c0_109] : memref<8x128x10xf32, #tpu.memory_space<vmem>>, vector<1x128x10xf32>
    %103 = vector.shape_cast %102 : vector<1x128x10xf32> to vector<128x10xf32>
    %cst_110 = arith.constant dense<0.000000e+00> : vector<2x10xf32>
    %104 = tpu.matmul %101, %103, %cst_110 {dimension_numbers = #tpu.dot_dimension_numbers<[1], [0], [0], [1], [0, 0, 1, 1], [], []>} : vector<2x128xf32>, vector<128x10xf32>, vector<2x10xf32> -> vector<2x10xf32>
    %105 = arith.addf %98, %104 : vector<2x10xf32>
    %c0_111 = arith.constant 0 : index
    %c0_112 = arith.constant 0 : index
    %106 = vector.load %arg9[%c0_111, %c0_112] : memref<1x10xf32, #tpu.memory_space<vmem>>, vector<1x10xf32>
    %107 = vector.broadcast %106 : vector<1x10xf32> to vector<2x10xf32>
    %108 = arith.addf %105, %107 : vector<2x10xf32>
    %c0_113 = arith.constant 0 : index
    %c0_114 = arith.constant 0 : index
    %109 = vector.load %arg10[%c0_113, %c0_114] : memref<2x10xf32, #tpu.memory_space<vmem>>, vector<2x10xf32>
    tpu.vector_store %arg10[%c0_113, %c0_114], %108 {strides = array<i32>} : memref<2x10xf32, #tpu.memory_space<vmem>>, vector<2x10xf32>,
    return
  }
}

</mosaic_0001>

<bundles_post_ra>
// kernel: tile.10
= control target key start
LH: loop header
LB: loop body
LE: loop exit
PB: predicated region body
PF: predicated region fallthrough
CT: control target
= control target key end

     0   :  { %s28_s0 = inlined_call_operand.vmem [shape: f32[8], index: 0, kind: input, shape index: {}]   ;;  %s29_s1 = inlined_call_operand.vmem [shape: f32[16,8], index: 1, kind: output, shape index: {}]  }
   0x1   :  { %v4_v0 = vld [vmem:[%s28_s0] ss:$0 sm:$0xff] }
   0x2   :  { %5 = vst [vmem:[%s29_s1] sm:$0xff] %v4_v0  ;;  %8 = vst [vmem:[%s29_s1 + $0x8] sm:$0xff] %v4_v0 }

// kernel: tile.11
= control target key start
LH: loop header
LB: loop body
LE: loop exit
PB: predicated region body
PF: predicated region fallthrough
CT: control target
= control target key end

     0   :  { %s131_s10 = smov 120   ;;  %s132_s11 = smov 104   ;;  %vm3_vm0 = vcmask 64512   ;;  %vm9_vm1 = vcmask 1048512   ;;  %vm15_vm2 = vcmask 982912   ;;  %vm21_vm3 = vcmask 917312   ;;  %s207_s0 = inlined_call_operand.vmem [shape: f32[16,8], index: 0, kind: input, shape index: {}]   ;;  %s208_s1 = inlined_call_operand.vmem [shape: f32[1,128], index: 1, kind: output, shape index: {}]  }
   0x1   :  { %v101_v0 = vld [vmem:[%s207_s0 + $0xf] sm:$0x1]   ;;  %v103_v1 = vld [vmem:[%s207_s0 + $0xd] sm:$0x1]   ;;  %v102_v2 = vld [vmem:[%s207_s0 + $0xe] sm:$0x1]  }
   0x2   :  { %7 = vrot.lane.b32.xlu0 %v101_v0, %s131_s10  ;;  %19 = vrot.lane.b32.xlu1 %v103_v1, %s132_s11  ;;  %v104_v3 = vld [vmem:[%s207_s0 + $0xc] sm:$0x1]   ;;  %s133_s16 = smov 112   ;;  %s134_s17 = smov 96   ;;  %v105_v4 = vld [vmem:[%s207_s0 + $0xb] sm:$0x1]  }
   0x3   :  { %v106_v5 = vld [vmem:[%s207_s0 + $0xa] sm:$0x1]   ;;  %v2_v6 = vld [vmem:[%s207_s0] sm:$0x1]   ;;  %s135_s24 = smov 88   ;;  %s136_s25 = smov 80  }
   0x4   :  { %4 = vst.msk [vmem:[#allocation0] sm:$0x1] %vm3_vm0, %v2_v6   ;;  %v107_v7 = vld [vmem:[%s207_s0 + $0x9] sm:$0x1]   ;;  %v108_v8 = vld [vmem:[%s207_s0 + $0x8] sm:$0x1]  }
   0x5   :  { %s137_s30 = smov 72   ;;  %s138_s2 = smov 64   ;;  %v109_v9 = vld [vmem:[%s207_s0 + $0x7] sm:$0x1]   ;;  %v110_v10 = vld [vmem:[%s207_s0 + $0x6] sm:$0x1]  }
   0x6   :  { %13 = vrot.lane.b32.xlu0 %v102_v2, %s133_s16  ;;  %25 = vrot.lane.b32.xlu1 %v104_v3, %s134_s17  ;;  %s139_s7 = smov 56   ;;  %s140_s8 = smov 48   ;;  %v111_v11 = vld [vmem:[%s207_s0 + $0x5] sm:$0x1]   ;;  %v112_v12 = vld [vmem:[%s207_s0 + $0x4] sm:$0x1]  }
   0x7   :  { %s141_s13 = smov 40   ;;  %s142_s14 = smov 32   ;;  %v113_v13 = vld [vmem:[%s207_s0 + $0x3] sm:$0x1]   ;;  %v114_v14 = vld [vmem:[%s207_s0 + $0x2] sm:$0x1]  }
   0x8   :  { %s143_s19 = smov 24   ;;  %s144_s20 = smov 16   ;;  %v115_v15 = vld [vmem:[%s207_s0 + $0x1] sm:$0x1]   ;;  %vm27_vm4 = vcmask 851712   ;;  %vm33_vm5 = vcmask 786112  }
   0x9   :  { %s145_s0 = smov 8   ;;  %vm39_vm6 = vcmask 720512   ;;  %vm45_vm7 = vcmask 654912   ;;  %vm51_vm8 = vcmask 589312   ;;  %vm57_vm9 = vcmask 523712  }
   0xa   :  { %31 = vrot.lane.b32.xlu0 %v105_v4, %s135_s24  ;;  %37 = vrot.lane.b32.xlu1 %v106_v5, %s136_s25  ;;  %vm63_vm10 = vcmask 458112   ;;  %vm69_vm11 = vcmask 392512   ;;  %vm75_vm12 = vcmask 326912   ;;  %vm81_vm13 = vcmask 261312  }
   0xb   :  { %vm87_vm14 = vcmask 195712   ;;  %vm93_vm15 = vcmask 130112  }
   0xe   :  { %43 = vrot.lane.b32.xlu0 %v107_v7, %s137_s30  ;;  %49 = vrot.lane.b32.xlu1 %v108_v8, %s138_s2 }
  0x12   :  { %55 = vrot.lane.b32.xlu0 %v109_v9, %s139_s7  ;;  %61 = vrot.lane.b32.xlu1 %v110_v10, %s140_s8 }
  0x16   :  { %67 = vrot.lane.b32.xlu0 %v111_v11, %s141_s13  ;;  %73 = vrot.lane.b32.xlu1 %v112_v12, %s142_s14 }
  0x1a   :  { %79 = vrot.lane.b32.xlu0 %v113_v13, %s143_s19  ;;  %85 = vrot.lane.b32.xlu1 %v114_v14, %s144_s20 }
  0x1e   :  { %91 = vrot.lane.b32.xlu0 %v115_v15, %s145_s0 }
  0x74   :  { %v8_v16 = vpop.permute.xlu0 %7   ;;  %v20_v17 = vpop.permute.xlu1 %19  }
  0x75   :  { %10 = vst.msk [vmem:[#allocation0] sm:$0x1] %vm9_vm1, %v8_v16  }
  0x78   :  { %v14_v18 = vpop.permute.xlu0 %13   ;;  %v26_v19 = vpop.permute.xlu1 %25  }
  0x79   :  { %16 = vst.msk [vmem:[#allocation0] sm:$0x1] %vm15_vm2, %v14_v18  }
  0x7a   :  { %22 = vst.msk [vmem:[#allocation0] sm:$0x1] %vm21_vm3, %v20_v17  }
  0x7b   :  { %28 = vst.msk [vmem:[#allocation0] sm:$0x1] %vm27_vm4, %v26_v19  }
  0x7c   :  { %v32_v20 = vpop.permute.xlu0 %31   ;;  %v38_v21 = vpop.permute.xlu1 %37  }
  0x7d   :  { %34 = vst.msk [vmem:[#allocation0] sm:$0x1] %vm33_vm5, %v32_v20  }
  0x7e   :  { %40 = vst.msk [vmem:[#allocation0] sm:$0x1] %vm39_vm6, %v38_v21  }
  0x80   :  { %v44_v22 = vpop.permute.xlu0 %43   ;;  %v50_v23 = vpop.permute.xlu1 %49  }
  0x81   :  { %46 = vst.msk [vmem:[#allocation0] sm:$0x1] %vm45_vm7, %v44_v22  }
  0x82   :  { %52 = vst.msk [vmem:[#allocation0] sm:$0x1] %vm51_vm8, %v50_v23  }
  0x84   :  { %v56_v24 = vpop.permute.xlu0 %55   ;;  %v62_v25 = vpop.permute.xlu1 %61  }
  0x85   :  { %58 = vst.msk [vmem:[#allocation0] sm:$0x1] %vm57_vm9, %v56_v24  }
  0x86   :  { %64 = vst.msk [vmem:[#allocation0] sm:$0x1] %vm63_vm10, %v62_v25  }
  0x88   :  { %v68_v26 = vpop.permute.xlu0 %67   ;;  %v74_v27 = vpop.permute.xlu1 %73  }
  0x89   :  { %70 = vst.msk [vmem:[#allocation0] sm:$0x1] %vm69_vm11, %v68_v26  }
  0x8a   :  { %76 = vst.msk [vmem:[#allocation0] sm:$0x1] %vm75_vm12, %v74_v27  }
  0x8c   :  { %v80_v28 = vpop.permute.xlu0 %79   ;;  %v86_v29 = vpop.permute.xlu1 %85  }
  0x8d   :  { %82 = vst.msk [vmem:[#allocation0] sm:$0x1] %vm81_vm13, %v80_v28  }
  0x8e   :  { %88 = vst.msk [vmem:[#allocation0] sm:$0x1] %vm87_vm14, %v86_v29  }
  0x90   :  { %v92_v30 = vpop.permute.xlu0 %91  }
  0x91   :  { %94 = vst.msk [vmem:[#allocation0] sm:$0x1] %vm93_vm15, %v92_v30  }
  0x98   :  { %v98_v31 = vld [vmem:[#allocation0] sm:$0x1] }
  0x99   :  { %100 = vst [vmem:[%s208_s1] sm:$0x1] %v98_v31 }

// kernel: tile.14
= control target key start
LH: loop header
LB: loop body
LE: loop exit
PB: predicated region body
PF: predicated region fallthrough
CT: control target
= control target key end

     0   :  { %s22_s0 = inlined_call_operand.vmem [shape: f32[16], index: 0, kind: input, shape index: {}]   ;;  %s23_s1 = inlined_call_operand.vmem [shape: f32[8,16], index: 1, kind: output, shape index: {}]  }
   0x1   :  { %v4_v0 = vld [vmem:[%s22_s0] ss:$0 sm:$0xff] }
   0x2   :  { %5 = vst [vmem:[%s23_s1] sm:$0xff] %v4_v0 }

// kernel: tile.15
= control target key start
LH: loop header
LB: loop body
LE: loop exit
PB: predicated region body
PF: predicated region fallthrough
CT: control target
= control target key end

     0   :  { %s67_s10 = smov 112   ;;  %s68_s11 = smov 80   ;;  %vm3_vm0 = vcmask 130048   ;;  %vm9_vm1 = vcmask 1048448   ;;  %vm15_vm2 = vcmask 917248   ;;  %vm21_vm3 = vcmask 786048   ;;  %s111_s0 = inlined_call_operand.vmem [shape: f32[8,16], index: 0, kind: input, shape index: {}]   ;;  %s112_s1 = inlined_call_operand.vmem [shape: f32[1,128], index: 1, kind: output, shape index: {}]  }
   0x1   :  { %v53_v0 = vld [vmem:[%s111_s0 + $0x7] sm:$0x1]   ;;  %v55_v1 = vld [vmem:[%s111_s0 + $0x5] sm:$0x1]   ;;  %v54_v2 = vld [vmem:[%s111_s0 + $0x6] sm:$0x1]  }
   0x2   :  { %7 = vrot.lane.b32.xlu0 %v53_v0, %s67_s10  ;;  %19 = vrot.lane.b32.xlu1 %v55_v1, %s68_s11  ;;  %v56_v3 = vld [vmem:[%s111_s0 + $0x4] sm:$0x1]   ;;  %v2_v4 = vld [vmem:[%s111_s0] sm:$0x1]   ;;  %s69_s18 = smov 96   ;;  %s70_s19 = smov 64  }
   0x3   :  { %4 = vst.msk [vmem:[#allocation0] sm:$0x1] %vm3_vm0, %v2_v4   ;;  %v57_v5 = vld [vmem:[%s111_s0 + $0x3] sm:$0x1]   ;;  %v58_v6 = vld [vmem:[%s111_s0 + $0x2] sm:$0x1]  }
   0x4   :  { %s71_s24 = smov 48   ;;  %s72_s25 = smov 32   ;;  %v59_v7 = vld [vmem:[%s111_s0 + $0x1] sm:$0x1]   ;;  %vm27_vm4 = vcmask 654848   ;;  %vm33_vm5 = vcmask 523648  }
   0x5   :  { %s73_s0 = smov 16   ;;  %vm39_vm6 = vcmask 392448   ;;  %vm45_vm7 = vcmask 261248  }
   0x6   :  { %13 = vrot.lane.b32.xlu0 %v54_v2, %s69_s18  ;;  %25 = vrot.lane.b32.xlu1 %v56_v3, %s70_s19 }
   0xa   :  { %31 = vrot.lane.b32.xlu0 %v57_v5, %s71_s24  ;;  %37 = vrot.lane.b32.xlu1 %v58_v6, %s72_s25 }
   0xe   :  { %43 = vrot.lane.b32.xlu0 %v59_v7, %s73_s0 }
  0x74   :  { %v8_v8 = vpop.permute.xlu0 %7   ;;  %v20_v9 = vpop.permute.xlu1 %19  }
  0x75   :  { %10 = vst.msk [vmem:[#allocation0] sm:$0x1] %vm9_vm1, %v8_v8  }
  0x78   :  { %v14_v10 = vpop.permute.xlu0 %13   ;;  %v26_v11 = vpop.permute.xlu1 %25  }
  0x79   :  { %16 = vst.msk [vmem:[#allocation0] sm:$0x1] %vm15_vm2, %v14_v10  }
  0x7a   :  { %22 = vst.msk [vmem:[#allocation0] sm:$0x1] %vm21_vm3, %v20_v9  }
  0x7b   :  { %28 = vst.msk [vmem:[#allocation0] sm:$0x1] %vm27_vm4, %v26_v11  }
  0x7c   :  { %v32_v12 = vpop.permute.xlu0 %31   ;;  %v38_v13 = vpop.permute.xlu1 %37  }
  0x7d   :  { %34 = vst.msk [vmem:[#allocation0] sm:$0x1] %vm33_vm5, %v32_v12  }
  0x7e   :  { %40 = vst.msk [vmem:[#allocation0] sm:$0x1] %vm39_vm6, %v38_v13  }
  0x80   :  { %v44_v14 = vpop.permute.xlu0 %43  }
  0x81   :  { %46 = vst.msk [vmem:[#allocation0] sm:$0x1] %vm45_vm7, %v44_v14  }
  0x88   :  { %v50_v15 = vld [vmem:[#allocation0] sm:$0x1] }
  0x89   :  { %52 = vst [vmem:[%s112_s1] sm:$0x1] %v50_v15 }

// kernel: _lambda_.1
= control target key start
LH: loop header
LB: loop body
LE: loop exit
PB: predicated region body
PF: predicated region fallthrough
CT: control target
= control target key end

     0   :  { %15 = vsyncpa [#allocation3], 0  ;;  %s4774_s0 = inlined_call_operand.vmem [shape: f32[64,96], index: 0, kind: input, shape index: {}]   ;;  %s4775_s1 = inlined_call_operand.vmem [shape: f32[3,32,64], index: 1, kind: input, shape index: {}]   ;;  %s4776_s2 = inlined_call_operand.vmem [shape: f32[3,96,128], index: 2, kind: input, shape index: {}]   ;;  %s4777_s3 = inlined_call_operand.vmem [shape: f32[1,128], index: 3, kind: input, shape index: {}]   ;;  %s4778_s4 = inlined_call_operand.vmem [shape: f32[3,16,32], index: 4, kind: input, shape index: {}]   ;;  %s4779_s5 = inlined_call_operand.vmem [shape: f32[3,128,128], index: 5, kind: input, shape index: {}]   ;;  %s4780_s6 = inlined_call_operand.vmem [shape: f32[1,128], index: 6, kind: input, shape index: {}]   ;;  %s4781_s7 = inlined_call_operand.vmem [shape: f32[8,2,16], index: 7, kind: input, shape index: {}]   ;;  %s4782_s8 = inlined_call_operand.hbm [shape: f32[8,128,10], index: 8, kind: input, shape index: {}]   ;;  %s4783_s9 = inlined_call_operand.vmem [shape: f32[1,10], index: 9, kind: input, shape index: {}]   ;;  %s4784_s10 = inlined_call_operand.hbm [shape: f32[2,10], index: 10, kind: output, shape index: {}]  }
   0x1   :  { %16 = vsyncpa [#allocation4], 0  ;;  %s4164_s13 = smov [#allocation2]   ;;  %s4116_s17 = scalar_lea.hbm %s4782_s8, 16384 }
   0x2   :  { %s38_s14 = sshll.u32 %s4164_s13, 4  ;;  %p4117_p0 = scmp.ne.s32.totalorder %s4782_s8, %s4116_s17  ;;  %s39_s14 = int_to_ptr.vmem [resolvable:$true] %s38_s14 }
   0x3   :  { %p4120_p1 = scmp.lt.u32.totalorder %s4116_s17, %s4782_s8 }
   0x5   :  { %p4122_p2 = pnand %p4120_p1, %p4117_p0 }
   0x7   :  { %4125 = shalt.err (!%p4122_p2)
}
   0x8   :  { %s4126_s22 = scalar_lea.vmem %s39_s14, 16384  ;;  %p4131_p4 = scmp.lt.s32.totalorder %s39_s14, %s39_s14 }
   0x9   :  { %p4127_p3 = scmp.ne.s32.totalorder %s39_s14, %s4126_s22  ;;  %p4132_p5 = scmp.lt.s32.totalorder %s4126_s22, %s4126_s22 }
   0xb   :  { %p4133_p6 = por %p4132_p5, %p4131_p4 }
   0xd   :  { %p4134_p7 = pnand %p4133_p6, %p4127_p3 }
   0xf   :  { %4137 = shalt.err (!%p4134_p7)
}
  0x10   :  { %s4165_s23 = smov 128   ;;  %s4166_s24 = smov 8  }
  0x11   :  { %44 = dma.hbm_to_vmem [thread:$0]  %s4782_s8, 16384, %s39_s14, [#allocation3], %s4165_s23, %s4165_s23, %s4166_s24  }
  0x12   :  { %4160 = dma.done.wait [#allocation3], 16384  }
  0x13   :  { %4161 = vsyncadd [#allocation3], 4294950912  ;;  %v50_v0 = vld [vmem:[%s4774_s0] sm:$0xff]  ;;  %v51_v1 = vld [vmem:[%s4774_s0 + $0x8] sm:$0xff]  ;;  %vm62_vm0 = vcmask 523264   ;;  %vm287_vm1 = vcmask 785408  }
  0x14   :  { %v52_v2 = vld [vmem:[%s4774_s0 + $0x10] sm:$0xff]  ;;  %v3641_v3 = vpack.c.bf16 %v51_v1, %v50_v0  ;;  %v53_v4 = vld [vmem:[%s4774_s0 + $0x18] sm:$0xff]  ;;  %v54_v6 = vld [vmem:[%s4774_s0 + $0x20] sm:$0xff]  ;;  %vm715_vm2 = vcmask 261120   ;;  %vm4168_vm3 = vmmov 0   ;;  %vm1254_vm4 = vcmask 130048  }
  0x15   :  { %v3645_v5 = vpack.c.bf16 %v53_v4, %v52_v2  ;;  %v55_v7 = vld [vmem:[%s4774_s0 + $0x28] sm:$0xff]  ;;  %v58_v8 = vld [vmem:[%s4775_s1] sm:$0xff]  ;;  %v56_v10 = vld [vmem:[%s4774_s0 + $0x30] sm:$0xff]  ;;  %s4170_s25 = smov [#allocation5]   ;;  %vm2562_vm5 = vcmask 74752  }
  0x16   :  { %3642 = vmatprep.subr.bf16.mxu1 %v3641_v3  ;;  %3027 = vmatprep.mubr.msk.f32.mxu1 %vm62_vm0, %v58_v8  ;;  %v3649_v9 = vpack.c.bf16 %v55_v7, %v54_v6  ;;  %v57_v11 = vld [vmem:[%s4774_s0 + $0x38] sm:$0xff]  ;;  %v2591_v12 = vld [vmem:[%s4776_s2 + $0x60] sm:$0xff]  ;;  %v2592_v13 = vld [vmem:[%s4776_s2 + $0x68] sm:$0xff]  ;;  %s2570_s26 = sshll.u32 %s4170_s25, 4  ;;  %s2571_s26 = int_to_ptr.vmem [resolvable:$true] %s2570_s26 }
  0x17   :  { %3644 = vmatpush3.bf16.msra.mxu1 %v3641_v3  ;;  %v2593_v14 = vld [vmem:[%s4776_s2 + $0x70] sm:$0xff]  ;;  %v2594_v15 = vld [vmem:[%s4776_s2 + $0x78] sm:$0xff]  ;;  %v3673_v16 = vpack.c.bf16 %v2592_v13, %v2591_v12  ;;  %v3653_v18 = vpack.c.bf16 %v57_v11, %v56_v10  ;;  %v59_v19 = vld [vmem:[%s4775_s1 + $0x8] sm:$0xff]  ;;  %s4138_s27 = scalar_lea.vmem %s2571_s26, 32  ;;  %p4143_p9 = scmp.lt.s32.totalorder %s2571_s26, %s2571_s26 }
  0x18   :  { %3646 = vmatprep.subr.bf16.mxu1 %v3645_v5  ;;  %v3677_v17 = vpack.c.bf16 %v2594_v15, %v2593_v14  ;;  %v60_v20 = vld [vmem:[%s4775_s1 + $0x10] sm:$0xff]  ;;  %v61_v21 = vld [vmem:[%s4775_s1 + $0x18] sm:$0xff]  ;;  %v2583_v22 = vld [vmem:[%s4775_s1 + $0x20] sm:$0xff]  ;;  %p4139_p8 = scmp.ne.s32.totalorder %s2571_s26, %s4138_s27  ;;  %p4144_p10 = scmp.lt.s32.totalorder %s4138_s27, %s4138_s27 }
  0x19   :  { %3674 = vmatprep.subr.bf16.mxu0 %v3673_v16  ;;  %v2584_v23 = vld [vmem:[%s4775_s1 + $0x28] sm:$0xff]  ;;  %v2585_v24 = vld [vmem:[%s4775_s1 + $0x30] sm:$0xff]  ;;  %v2586_v25 = vld [vmem:[%s4775_s1 + $0x38] sm:$0xff] }
  0x1a   :  { %3676 = vmatpush3.bf16.msra.mxu0 %v3673_v16  ;;  %v2611_v26 = vld [vmem:[%s4775_s1 + $0x40] sm:$0xff]  ;;  %v2612_v27 = vld [vmem:[%s4775_s1 + $0x48] sm:$0xff]  ;;  %v2613_v28 = vld [vmem:[%s4775_s1 + $0x50] sm:$0xff]  ;;  %p4145_p11 = por %p4144_p10, %p4143_p9 }
  0x1b   :  { %3648 = vmatpush3.bf16.msra.mxu1 %v3645_v5  ;;  %3678 = vmatprep.subr.bf16.mxu0 %v3677_v17  ;;  %v2614_v29 = vld [vmem:[%s4775_s1 + $0x58] sm:$0xff]  ;;  %v2595_v30 = vld [vmem:[%s4776_s2 + $0x80] sm:$0xff]  ;;  %v2596_v31 = vld [vmem:[%s4776_s2 + $0x88] sm:$0xff] }
  0x1c   :  { %3650 = vmatprep.subr.bf16.mxu1 %v3649_v9  ;;  %v3681_v32 = vpack.c.bf16 %v2596_v31, %v2595_v30  ;;  %v2597_v33 = vld [vmem:[%s4776_s2 + $0x90] sm:$0xff]  ;;  %v2598_v34 = vld [vmem:[%s4776_s2 + $0x98] sm:$0xff]  ;;  %v2599_v35 = vld [vmem:[%s4776_s2 + $0xa0] sm:$0xff]  ;;  %p4146_p12 = pnand %p4145_p11, %p4139_p8 }
  0x1d   :  { %v3685_v36 = vpack.c.bf16 %v2598_v34, %v2597_v33  ;;  %v2600_v37 = vld [vmem:[%s4776_s2 + $0xa8] sm:$0xff]  ;;  %v2601_v39 = vld [vmem:[%s4776_s2 + $0xb0] sm:$0xff]  ;;  %v2602_v40 = vld [vmem:[%s4776_s2 + $0xb8] sm:$0xff] }
  0x1e   :  { %3680 = vmatpush3.bf16.msra.mxu0 %v3677_v17  ;;  %v3689_v38 = vpack.c.bf16 %v2600_v37, %v2599_v35  ;;  %v3693_v41 = vpack.c.bf16 %v2602_v40, %v2601_v39  ;;  %v160_v42 = vld [vmem:[%s4776_s2] sm:$0xff]  ;;  %v161_v43 = vld [vmem:[%s4776_s2 + $0x8] sm:$0xff]  ;;  %v162_v49 = vld [vmem:[%s4776_s2 + $0x10] sm:$0xff] }
  0x1f   :  { %3652 = vmatpush3.bf16.msra.mxu1 %v3649_v9  ;;  %3682 = vmatprep.subr.bf16.mxu0 %v3681_v32  ;;  %v3697_v44 = vpack.c.bf16 %v161_v43, %v160_v42  ;;  %v163_v50 = vld [vmem:[%s4776_s2 + $0x18] sm:$0xff]  ;;  %v164_v54 = vld [vmem:[%s4776_s2 + $0x20] sm:$0xff]  ;;  %v165_v55 = vld [vmem:[%s4776_s2 + $0x28] sm:$0xff] }
  0x20   :  { %3654 = vmatprep.subr.bf16.mxu1 %v3653_v18  ;;  %v3701_v53 = vpack.c.bf16 %v163_v50, %v162_v49  ;;  %v3705_v58 = vpack.c.bf16 %v165_v55, %v164_v54  ;;  %v166_v59 = vld [vmem:[%s4776_s2 + $0x30] sm:$0xff]  ;;  %v167_v60 = vld [vmem:[%s4776_s2 + $0x38] sm:$0xff]  ;;  %v168_v62 = vld [vmem:[%s4776_s2 + $0x40] sm:$0xff] }
  0x21   :  { %v3709_v61 = vpack.c.bf16 %v167_v60, %v166_v59  ;;  %v169_v63 = vld [vmem:[%s4776_s2 + $0x48] sm:$0xff]  ;;  %v170_v1 = vld [vmem:[%s4776_s2 + $0x50] sm:$0xff]  ;;  %v171_v2 = vld [vmem:[%s4776_s2 + $0x58] sm:$0xff] }
  0x22   :  { %3684 = vmatpush3.bf16.msra.mxu0 %v3681_v32  ;;  %v3713_v0 = vpack.c.bf16 %v169_v63, %v168_v62  ;;  %v3717_v4 = vpack.c.bf16 %v171_v2, %v170_v1  ;;  %v2619_v6 = vld [vmem:[%s4776_s2 + $0xc0] sm:$0xff]  ;;  %v2620_v7 = vld [vmem:[%s4776_s2 + $0xc8] sm:$0xff]  ;;  %v2621_v11 = vld [vmem:[%s4776_s2 + $0xd0] sm:$0xff] }
  0x23   :  { %3656 = vmatpush3.bf16.msra.mxu1 %v3653_v18  ;;  %3686 = vmatprep.subr.bf16.mxu0 %v3685_v36  ;;  %v2622_v12 = vld [vmem:[%s4776_s2 + $0xd8] sm:$0xff]  ;;  %v2623_v14 = vld [vmem:[%s4776_s2 + $0xe0] sm:$0xff]  ;;  %v2624_v15 = vld [vmem:[%s4776_s2 + $0xe8] sm:$0xff] }
  0x24   :  { %3658 = vmatprep.subr.bf16.mxu1 %v3641_v3  ;;  %v3741_v13 = vpack.c.bf16 %v2622_v12, %v2621_v11  ;;  %v3745_v16 = vpack.c.bf16 %v2624_v15, %v2623_v14  ;;  %v2625_v17 = vld [vmem:[%s4776_s2 + $0xf0] sm:$0xff]  ;;  %v714_v43 = vld [vmem:[%s4778_s4 + $0x8] sm:$0xff]  ;;  %v2645_v50 = vld [vmem:[%s4779_s5 + $0x98] sm:$0xff] }
  0x25   :  { %v2644_v49 = vld [vmem:[%s4779_s5 + $0x90] sm:$0xff]  ;;  %v2647_v54 = vld [vmem:[%s4779_s5 + $0xa8] sm:$0xff]  ;;  %v2650_v59 = vld [vmem:[%s4779_s5 + $0xc0] sm:$0xff] }
  0x26   :  { %3028 = vmatmul.mubr.msk.f32.vlgmr.msra.gmra.mrb[0].mxu1 %vm62_vm0, %v59_v19  ;;  %3688 = vmatpush3.bf16.msra.mxu0 %v3685_v36  ;;  %v2651_v60 = vld [vmem:[%s4779_s5 + $0xc8] sm:$0xff]  ;;  %v2652_v62 = vld [vmem:[%s4779_s5 + $0xd0] sm:$0xff]  ;;  %v2653_v63 = vld [vmem:[%s4779_s5 + $0xd8] sm:$0xff] }
  0x27   :  { %3660 = vmatpush3.bf16.msra.mxu1 %v3641_v3  ;;  %3030 = vmatprep.mubr.msk.f32.mxu1 %vm62_vm0, %v60_v20  ;;  %v2627_v20 = vld [vmem:[%s4776_s2 + $0x100] sm:$0xff]  ;;  %v2655_v2 = vld [vmem:[%s4779_s5 + $0xe8] sm:$0xff]  ;;  %v799_v14 = vld [vmem:[%s4779_s5 + $0x10] sm:$0xff] }
  0x28   :  { %3662 = vmatprep.subr.bf16.mxu1 %v3645_v5  ;;  %3690 = vmatprep.subr.bf16.mxu0 %v3689_v38  ;;  %v2654_v1 = vld [vmem:[%s4779_s5 + $0xe0] sm:$0xff]  ;;  %v800_v15 = vld [vmem:[%s4779_s5 + $0x18] sm:$0xff] }
  0x2a   :  { %3031 = vmatmul.mubr.msk.f32.gmra.mrb[2].mxu1 %vm62_vm0, %v61_v21  ;;  %3692 = vmatpush3.bf16.msra.mxu0 %v3689_v38  ;;  %v2628_v21 = vld [vmem:[%s4776_s2 + $0x108] sm:$0xff] }
  0x2b   :  { %3664 = vmatpush3.bf16.msra.mxu1 %v3645_v5  ;;  %3049 = vmatprep.mubr.msk.f32.mxu1 %vm62_vm0, %v2583_v22  ;;  %v3753_v22 = vpack.c.bf16 %v2628_v21, %v2627_v20  ;;  %v802_v20 = vld [vmem:[%s4779_s5 + $0x28] sm:$0xff] }
  0x2c   :  { %3666 = vmatprep.subr.bf16.mxu1 %v3649_v9  ;;  %3694 = vmatprep.subr.bf16.mxu0 %v3693_v41 }
  0x2e   :  { %3696 = vmatpush3.bf16.msra.mxu0 %v3693_v41 }
  0x2f   :  { %3668 = vmatpush3.bf16.msra.mxu1 %v3649_v9  ;;  %3698 = vmatprep.subr.bf16.mxu0 %v3697_v44 }
  0x30   :  { %3670 = vmatprep.subr.bf16.mxu1 %v3653_v18 }
  0x33   :  { %3672 = vmatpush3.bf16.msra.mxu1 %v3653_v18 }
  0x34   :  { %3722 = vmatprep.subr.bf16.mxu1 %v3641_v3 }
  0x36   :  { %3050 = vmatmul.mubr.msk.f32.vlgmr.msra.gmra.mrb[4].mxu1 %vm62_vm0, %v2584_v23  ;;  %v2629_v23 = vld [vmem:[%s4776_s2 + $0x110] sm:$0xff] }
  0x37   :  { %3052 = vmatprep.mubr.msk.f32.mxu1 %vm62_vm0, %v2585_v24  ;;  %3724 = vmatpush3.bf16.msra.mxu1 %v3641_v3  ;;  %v2630_v24 = vld [vmem:[%s4776_s2 + $0x118] sm:$0xff] }
  0x38   :  { %3726 = vmatprep.subr.bf16.mxu1 %v3645_v5 }
  0x3a   :  { %3053 = vmatmul.mubr.msk.f32.gmra.mrb[6].mxu1 %vm62_vm0, %v2586_v25  ;;  %v3757_v25 = vpack.c.bf16 %v2630_v24, %v2629_v23  ;;  %v804_v23 = vld [vmem:[%s4779_s5 + $0x38] sm:$0xff] }
  0x3b   :  { %3728 = vmatpush3.bf16.msra.mxu1 %v3645_v5  ;;  %3131 = vmatprep.mubr.msk.f32.mxu1 %vm62_vm0, %v2611_v26  ;;  %v713_v26 = vld [vmem:[%s4778_s4] sm:$0xff] }
  0x3c   :  { %3730 = vmatprep.subr.bf16.mxu1 %v3649_v9 }
  0x3f   :  { %3732 = vmatpush3.bf16.msra.mxu1 %v3649_v9  ;;  %v3737_v9 = vpack.c.bf16 %v2620_v7, %v2619_v6  ;;  %v797_v7 = vld [vmem:[%s4779_s5] sm:$0xff] }
  0x40   :  { %3734 = vmatprep.subr.bf16.mxu1 %v3653_v18 }
  0x43   :  { %3736 = vmatpush3.bf16.msra.mxu1 %v3653_v18  ;;  %v2626_v18 = vld [vmem:[%s4776_s2 + $0xf8] sm:$0xff] }
  0x44   :  { %v3749_v19 = vpack.c.bf16 %v2626_v18, %v2625_v17  ;;  %v3813_v18 = vpack.c.bf16 %v800_v15, %v799_v14  ;;  %v1424_v15 = vld [vmem:[#allocation2 + $0xa0] sm:$0xff] }
  0x46   :  { %3132 = vmatmul.mubr.msk.f32.vlgmr.msra.gmra.mrb[8].mxu1 %vm62_vm0, %v2612_v27  ;;  %v2658_v27 = vld [vmem:[%s4778_s4 + $0x20] sm:$0xff] }
  0x47   :  { %3134 = vmatprep.mubr.msk.f32.mxu1 %vm62_vm0, %v2613_v28  ;;  %v2635_v28 = vld [vmem:[%s4777_s3] ss:$0 sm:$0xff] }
  0x4a   :  { %3135 = vmatmul.mubr.msk.f32.gmra.mrb[10].mxu1 %vm62_vm0, %v2614_v29 }
  0x4b   :  { %3175 = vmatprep.mubr.msk.f32.mxu1 %vm715_vm2, %v713_v26  ;;  %v806_v26 = vld [vmem:[%s4779_s5 + $0x48] sm:$0xff] }
  0xf9   :  { %v3029_v45 = vpop.f32.mrb[0].mxu1 }
  0xfa   :  { %v141_v46 = vpop.f32.mrb[1].mxu1 }
  0xfd   :  { %v3032_v47 = vpop.f32.mrb[2].mxu1 }
  0xfe   :  { %v151_v48 = vpop.f32.mrb[3].mxu1 }
 0x109   :  { %v3051_v51 = vpop.f32.mrb[4].mxu1 }
 0x10a   :  { %v255_v52 = vpop.f32.mrb[5].mxu1 }
 0x10b   :  { %3079 = vmatprep.mubr.msk.f32.mxu0 %vm287_vm1, %v255_v52  ;;  %v3781_v52 = vpack.c.bf16 %v2645_v50, %v2644_v49  ;;  %v2670_v49 = vld [vmem:[%s4779_s5 + $0x140] sm:$0xff]  ;;  %v2671_v50 = vld [vmem:[%s4779_s5 + $0x148] sm:$0xff] }
 0x10c   :  { %3080 = vmatmul.mubr.msk.f32.vlgmr.msra.gmra.mrb[0].mxu0 %vm287_vm1, %v3051_v51  ;;  %v2639_v51 = vld [vmem:[%s4778_s4 + $0x18] sm:$0xff] }
 0x10d   :  { %3700 = vmatpush3.bf16.msra.mxu0 %v3697_v44  ;;  %v3054_v56 = vpop.f32.mrb[6].mxu1  ;;  %v2659_v44 = vld [vmem:[%s4778_s4 + $0x28] sm:$0xff] }
 0x10e   :  { %v265_v57 = vpop.f32.mrb[7].mxu1  ;;  %3702 = vmatprep.subr.bf16.mxu0 %v3701_v53 }
 0x10f   :  { %3082 = vmatprep.mubr.msk.f32.mxu0 %vm287_vm1, %v265_v57  ;;  %v2649_v57 = vld [vmem:[%s4779_s5 + $0xb8] sm:$0xff] }
 0x110   :  { %3083 = vmatmul.mubr.msk.f32.gmra.mrb[2].mxu0 %vm287_vm1, %v3054_v56  ;;  %v2648_v56 = vld [vmem:[%s4779_s5 + $0xb0] sm:$0xff] }
 0x111   :  { %3704 = vmatpush3.bf16.msra.mxu0 %v3701_v53  ;;  %3109 = vmatprep.mubr.msk.f32.mxu0 %vm287_vm1, %v141_v46  ;;  %v2642_v46 = vld [vmem:[%s4779_s5 + $0x80] sm:$0xff] }
 0x112   :  { %3706 = vmatprep.subr.bf16.mxu0 %v3705_v58  ;;  %v2646_v53 = vld [vmem:[%s4779_s5 + $0xa0] sm:$0xff] }
 0x113   :  { %v3785_v55 = vpack.c.bf16 %v2647_v54, %v2646_v53  ;;  %v2673_v53 = vld [vmem:[%s4779_s5 + $0x158] sm:$0xff] }
 0x115   :  { %3708 = vmatpush3.bf16.msra.mxu0 %v3705_v58  ;;  %v3789_v58 = vpack.c.bf16 %v2649_v57, %v2648_v56  ;;  %v2675_v56 = vld [vmem:[%s4779_s5 + $0x168] sm:$0xff] }
 0x116   :  { %3710 = vmatprep.subr.bf16.mxu0 %v3709_v61 }
 0x119   :  { %3712 = vmatpush3.bf16.msra.mxu0 %v3709_v61  ;;  %v3133_v3 = vpop.f32.mrb[8].mxu1  ;;  %v3793_v61 = vpack.c.bf16 %v2651_v60, %v2650_v59  ;;  %v2677_v59 = vld [vmem:[%s4779_s5 + $0x178] sm:$0xff] }
 0x11a   :  { %3714 = vmatprep.subr.bf16.mxu0 %v3713_v0  ;;  %v565_v5 = vpop.f32.mrb[9].mxu1 }
 0x11d   :  { %3716 = vmatpush3.bf16.msra.mxu0 %v3713_v0  ;;  %v3136_v8 = vpop.f32.mrb[10].mxu1  ;;  %v3797_v0 = vpack.c.bf16 %v2653_v63, %v2652_v62  ;;  %v4169_v62 = vmov 0.0   ;;  %v2678_v63 = vld [vmem:[%s4780_s6] ss:$0 sm:$0xff] }
 0x11e   :  { %3718 = vmatprep.subr.bf16.mxu0 %v3717_v4  ;;  %v575_v10 = vpop.f32.mrb[11].mxu1 }
 0x121   :  { %3720 = vmatpush3.bf16.msra.mxu0 %v3717_v4  ;;  %v2656_v4 = vld [vmem:[%s4779_s5 + $0xf0] sm:$0xff] }
 0x122   :  { %3738 = vmatprep.subr.bf16.mxu0 %v3737_v9 }
 0x124   :  { %3110 = vmatmul.mubr.msk.f32.vlgmr.msra.gmra.mrb[0].mxu0 %vm287_vm1, %v3029_v45  ;;  %v2638_v45 = vld [vmem:[%s4778_s4 + $0x10] sm:$0xff] }
 0x125   :  { %3112 = vmatprep.mubr.msk.f32.mxu0 %vm287_vm1, %v151_v48  ;;  %3740 = vmatpush3.bf16.msra.mxu0 %v3737_v9 }
 0x126   :  { %3742 = vmatprep.subr.bf16.mxu0 %v3741_v13 }
 0x128   :  { %3113 = vmatmul.mubr.msk.f32.gmra.mrb[2].mxu0 %vm287_vm1, %v3032_v47  ;;  %v2643_v47 = vld [vmem:[%s4779_s5 + $0x88] sm:$0xff] }
 0x129   :  { %3744 = vmatpush3.bf16.msra.mxu0 %v3741_v13  ;;  %3161 = vmatprep.mubr.msk.f32.mxu0 %vm287_vm1, %v565_v5  ;;  %v3777_v48 = vpack.c.bf16 %v2643_v47, %v2642_v46  ;;  %v2657_v5 = vld [vmem:[%s4779_s5 + $0xf8] sm:$0xff]  ;;  %v2668_v46 = vld [vmem:[%s4779_s5 + $0x130] sm:$0xff] }
 0x12a   :  { %3746 = vmatprep.subr.bf16.mxu0 %v3745_v16  ;;  %v3805_v6 = vpack.c.bf16 %v2657_v5, %v2656_v4  ;;  %v2669_v47 = vld [vmem:[%s4779_s5 + $0x138] sm:$0xff] }
 0x12d   :  { %3748 = vmatpush3.bf16.msra.mxu0 %v3745_v16 }
 0x12e   :  { %3750 = vmatprep.subr.bf16.mxu0 %v3749_v19 }
 0x131   :  { %3752 = vmatpush3.bf16.msra.mxu0 %v3749_v19  ;;  %v801_v19 = vld [vmem:[%s4779_s5 + $0x20] sm:$0xff] }
 0x132   :  { %3754 = vmatprep.subr.bf16.mxu0 %v3753_v22  ;;  %v3817_v21 = vpack.c.bf16 %v802_v20, %v801_v19  ;;  %v1427_v19 = vld [vmem:[#allocation2 + $0xb8] sm:$0xff] }
 0x135   :  { %3756 = vmatpush3.bf16.msra.mxu0 %v3753_v22  ;;  %v803_v22 = vld [vmem:[%s4779_s5 + $0x30] sm:$0xff] }
 0x136   :  { %3758 = vmatprep.subr.bf16.mxu0 %v3757_v25  ;;  %v3821_v24 = vpack.c.bf16 %v804_v23, %v803_v22  ;;  %v1429_v22 = vld [vmem:[#allocation2 + $0xc8] sm:$0xff] }
 0x139   :  { %3760 = vmatpush3.bf16.msra.mxu0 %v3757_v25  ;;  %v805_v25 = vld [vmem:[%s4779_s5 + $0x40] sm:$0xff] }
 0x13c   :  { %3162 = vmatmul.mubr.msk.f32.vlgmr.msra.gmra.mrb[0].mxu0 %vm287_vm1, %v3133_v3  ;;  %v3801_v3 = vpack.c.bf16 %v2655_v2, %v2654_v1 }
 0x13d   :  { %3164 = vmatprep.mubr.msk.f32.mxu0 %vm287_vm1, %v575_v10 }
 0x140   :  { %3165 = vmatmul.mubr.msk.f32.gmra.mrb[2].mxu0 %vm287_vm1, %v3136_v8  ;;  %v798_v8 = vld [vmem:[%s4779_s5 + $0x8] sm:$0xff] }
 0x141   :  { %3267 = vmatprep.mubr.msk.f32.mxu0 %vm715_vm2, %v2658_v27  ;;  %v3809_v9 = vpack.c.bf16 %v798_v8, %v797_v7  ;;  %v3825_v27 = vpack.c.bf16 %v806_v26, %v805_v25  ;;  %v1253_v7 = vld [vmem:[%s4781_s7] sm:$0x3]  ;;  %v1431_v25 = vld [vmem:[#allocation2 + $0xd8] sm:$0xff] }
 0x142   :  { %v1420_v8 = vld [vmem:[#allocation2 + $0x80] sm:$0xff] }
 0x20f   :  { %v3163_v29 = vpop.f32.mrb[0].mxu0 }
 0x210   :  { %v706_v30 = vadd.f32 %v3163_v29, %v2635_v28  ;;  %v675_v31 = vpop.f32.mrb[1].mxu0  ;;  %v808_v29 = vld [vmem:[%s4779_s5 + $0x58] sm:$0xff] }
 0x211   :  { %v705_v32 = vadd.f32 %v2635_v28, %v675_v31  ;;  %v809_v31 = vld [vmem:[%s4779_s5 + $0x60] sm:$0xff] }
 0x212   :  { %v710_v33 = vmax.f32 %v706_v30, 0.0 }
 0x213   :  { %v709_v34 = vmax.f32 %v705_v32, 0.0  ;;  %v3166_v35 = vpop.f32.mrb[2].mxu0  ;;  %v810_v32 = vld [vmem:[%s4779_s5 + $0x68] sm:$0xff] }
 0x214   :  { %v708_v36 = vadd.f32 %v3166_v35, %v2635_v28  ;;  %v685_v37 = vpop.f32.mrb[3].mxu0  ;;  %v812_v35 = vld [vmem:[%s4779_s5 + $0x78] sm:$0xff] }
 0x215   :  { %v3761_v38 = vpack.c.bf16 %v710_v33, %v709_v34  ;;  %v707_v39 = vadd.f32 %v2635_v28, %v685_v37  ;;  %v807_v28 = vld [vmem:[%s4779_s5 + $0x50] sm:$0xff]  ;;  %v3833_v33 = vpack.c.bf16 %v810_v32, %v809_v31  ;;  %v2662_v37 = vld [vmem:[%s4779_s5 + $0x100] sm:$0xff]  ;;  %v1435_v31 = vld [vmem:[#allocation2 + $0xf8] sm:$0xff] }
 0x216   :  { %v712_v40 = vmax.f32 %v708_v36, 0.0  ;;  %v3829_v30 = vpack.c.bf16 %v808_v29, %v807_v28  ;;  %v811_v34 = vld [vmem:[%s4779_s5 + $0x70] sm:$0xff]  ;;  %v1433_v28 = vld [vmem:[#allocation2 + $0xe8] sm:$0xff] }
 0x217   :  { %v711_v41 = vmax.f32 %v707_v39, 0.0  ;;  %3762 = vmatprep.subr.bf16.mxu1 %v3761_v38  ;;  %3842 = vmatprep.subr.bf16.mxu0 %v3761_v38  ;;  %v3837_v36 = vpack.c.bf16 %v812_v35, %v811_v34  ;;  %v1329_v34 = vld [vmem:[#allocation2 + $0x8] sm:$0xff] }
 0x218   :  { %3764 = vmatpush3.bf16.msra.mxu1 %v3761_v38  ;;  %3844 = vmatpush3.bf16.msra.mxu0 %v3761_v38 }
 0x219   :  { %v3765_v42 = vpack.c.bf16 %v712_v40, %v711_v41  ;;  %v2664_v40 = vld [vmem:[%s4779_s5 + $0x110] sm:$0xff]  ;;  %v2665_v41 = vld [vmem:[%s4779_s5 + $0x118] sm:$0xff] }
 0x21b   :  { %3766 = vmatprep.subr.bf16.mxu1 %v3765_v42  ;;  %3846 = vmatprep.subr.bf16.mxu0 %v3765_v42 }
 0x21c   :  { %3768 = vmatpush3.bf16.msra.mxu1 %v3765_v42  ;;  %3848 = vmatpush3.bf16.msra.mxu0 %v3765_v42 }
 0x21d   :  { %3770 = vmatprep.subr.bf16.mxu1 %v3761_v38 }
 0x21f   :  { %3176 = vmatmul.mubr.msk.f32.vlgmr.msra.gmra.mrb[12].mxu1 %vm715_vm2, %v714_v43  ;;  %3268 = vmatmul.mubr.msk.f32.vlgmr.msra.gmra.mrb[4].mxu0 %vm715_vm2, %v2659_v44  ;;  %v2666_v43 = vld [vmem:[%s4779_s5 + $0x120] sm:$0xff]  ;;  %v2667_v44 = vld [vmem:[%s4779_s5 + $0x128] sm:$0xff] }
 0x220   :  { %3772 = vmatpush3.bf16.msra.mxu1 %v3761_v38  ;;  %3186 = vmatprep.mubr.msk.f32.mxu1 %vm715_vm2, %v2638_v45  ;;  %v2663_v38 = vld [vmem:[%s4779_s5 + $0x108] sm:$0xff]  ;;  %v3857_v45 = vpack.c.bf16 %v2667_v44, %v2666_v43  ;;  %v1332_v43 = vld [vmem:[#allocation2 + $0x20] sm:$0xff] }
 0x221   :  { %3774 = vmatprep.subr.bf16.mxu1 %v3765_v42  ;;  %v3849_v39 = vpack.c.bf16 %v2663_v38, %v2662_v37  ;;  %3309 = vmatprep.mubr.msk.f32.mxu0 %vm4168_vm3, %v4169_v62  ;;  %v1330_v38 = vld [vmem:[#allocation2 + $0x10] sm:$0xff]  ;;  %v1333_v44 = vld [vmem:[#allocation2 + $0x28] sm:$0xff] }
 0x224   :  { %3776 = vmatpush3.bf16.msra.mxu1 %v3765_v42  ;;  %v3853_v42 = vpack.c.bf16 %v2665_v41, %v2664_v40 }
 0x225   :  { %3778 = vmatprep.subr.bf16.mxu1 %v3777_v48 }
 0x227   :  { %3187 = vmatmul.mubr.msk.f32.vlgmr.msra.gmra.mrb[14].mxu1 %vm715_vm2, %v2639_v51  ;;  %v3865_v51 = vpack.c.bf16 %v2671_v50, %v2670_v49  ;;  %v1336_v49 = vld [vmem:[#allocation2 + $0x40] sm:$0xff]  ;;  %v1337_v50 = vld [vmem:[#allocation2 + $0x48] sm:$0xff] }
 0x228   :  { %3780 = vmatpush3.bf16.msra.mxu1 %v3777_v48  ;;  %v3861_v48 = vpack.c.bf16 %v2669_v47, %v2668_v46  ;;  %v1334_v46 = vld [vmem:[#allocation2 + $0x30] sm:$0xff]  ;;  %v1335_v47 = vld [vmem:[#allocation2 + $0x38] sm:$0xff] }
 0x229   :  { %3782 = vmatprep.subr.bf16.mxu1 %v3781_v52 }
 0x22c   :  { %3784 = vmatpush3.bf16.msra.mxu1 %v3781_v52  ;;  %v2672_v52 = vld [vmem:[%s4779_s5 + $0x150] sm:$0xff] }
 0x22d   :  { %3786 = vmatprep.subr.bf16.mxu1 %v3785_v55  ;;  %v3869_v54 = vpack.c.bf16 %v2673_v53, %v2672_v52  ;;  %v1338_v52 = vld [vmem:[#allocation2 + $0x50] sm:$0xff]  ;;  %v1339_v53 = vld [vmem:[#allocation2 + $0x58] sm:$0xff] }
 0x230   :  { %3788 = vmatpush3.bf16.msra.mxu1 %v3785_v55  ;;  %v2674_v55 = vld [vmem:[%s4779_s5 + $0x160] sm:$0xff] }
 0x231   :  { %3790 = vmatprep.subr.bf16.mxu1 %v3789_v58  ;;  %v3873_v57 = vpack.c.bf16 %v2675_v56, %v2674_v55  ;;  %v1340_v55 = vld [vmem:[#allocation2 + $0x60] sm:$0xff]  ;;  %v1341_v56 = vld [vmem:[#allocation2 + $0x68] sm:$0xff] }
 0x234   :  { %3792 = vmatpush3.bf16.msra.mxu1 %v3789_v58  ;;  %v2676_v58 = vld [vmem:[%s4779_s5 + $0x170] sm:$0xff] }
 0x235   :  { %3794 = vmatprep.subr.bf16.mxu1 %v3793_v61  ;;  %v3877_v60 = vpack.c.bf16 %v2677_v59, %v2676_v58  ;;  %v1342_v58 = vld [vmem:[#allocation2 + $0x70] sm:$0xff]  ;;  %v1343_v59 = vld [vmem:[#allocation2 + $0x78] sm:$0xff] }
 0x238   :  { %3796 = vmatpush3.bf16.msra.mxu1 %v3793_v61  ;;  %v4167_v61 = vmov 0.0|0.0  }
 0x239   :  { %3798 = vmatprep.subr.bf16.mxu1 %v3797_v0  ;;  %3881 = vmatprep.subr.bf16.mxu0 %v4167_v61 }
 0x23c   :  { %3800 = vmatpush3.bf16.msra.mxu1 %v3797_v0 }
 0x23d   :  { %3802 = vmatprep.subr.bf16.mxu1 %v3801_v3 }
 0x240   :  { %3804 = vmatpush3.bf16.msra.mxu1 %v3801_v3 }
 0x241   :  { %3806 = vmatprep.subr.bf16.mxu1 %v3805_v6 }
 0x244   :  { %3808 = vmatpush3.bf16.msra.mxu1 %v3805_v6 }
 0x245   :  { %3810 = vmatprep.subr.bf16.mxu1 %v3809_v9 }
 0x2f2   :  { %v3177_v10 = vpop.f32.mrb[12].mxu1  ;;  %v4511_v11 = vpop.f32.mrb[4].mxu0 }
 0x2f3   :  { %v788_v12 = vpop.f32.mrb[13].mxu1  ;;  %v1139_v13 = vpop.f32.mrb[5].mxu0 }
 0x2fa   :  { %v3188_v16 = vpop.f32.mrb[14].mxu1 }
 0x2fb   :  { %v888_v17 = vpop.f32.mrb[15].mxu1 }
 0x2fc   :  { %3221 = vmatprep.mubr.f32.mxu1 %v888_v17 }
 0x2fd   :  { %3222 = vmatmul.mubr.f32.vlgmr.msra.gmra.mrb[16].mxu1 %v3188_v16  ;;  %v1425_v16 = vld [vmem:[#allocation2 + $0xa8] sm:$0xff] }
 0x2fe   :  { %3812 = vmatpush3.bf16.msra.mxu1 %v3809_v9  ;;  %3256 = vmatprep.mubr.f32.mxu1 %v788_v12  ;;  %v1421_v9 = vld [vmem:[#allocation2 + $0x88] sm:$0xff]  ;;  %v1422_v12 = vld [vmem:[#allocation2 + $0x90] sm:$0xff]  ;;  %v3894_v17 = vpack.c.bf16 %v1425_v16, %v1424_v15  ;;  %v1819_v16 = vld [vmem:[#allocation2 + $0x1a0] sm:$0xff] }
 0x2ff   :  { %3814 = vmatprep.subr.bf16.mxu1 %v3813_v18 }
 0x302   :  { %3816 = vmatpush3.bf16.msra.mxu1 %v3813_v18  ;;  %v1426_v18 = vld [vmem:[#allocation2 + $0xb0] sm:$0xff] }
 0x303   :  { %3818 = vmatprep.subr.bf16.mxu1 %v3817_v21  ;;  %v3897_v20 = vpack.c.bf16 %v1427_v19, %v1426_v18  ;;  %v1658_v19 = vld [vmem:[#allocation2 + $0x130] sm:$0xff] }
 0x306   :  { %3820 = vmatpush3.bf16.msra.mxu1 %v3817_v21  ;;  %v1428_v21 = vld [vmem:[#allocation2 + $0xc0] sm:$0xff] }
 0x307   :  { %3822 = vmatprep.subr.bf16.mxu1 %v3821_v24  ;;  %v3900_v23 = vpack.c.bf16 %v1429_v22, %v1428_v21  ;;  %v1821_v22 = vld [vmem:[#allocation2 + $0x1b0] sm:$0xff] }
 0x30a   :  { %3824 = vmatpush3.bf16.msra.mxu1 %v3821_v24  ;;  %v1430_v24 = vld [vmem:[#allocation2 + $0xd0] sm:$0xff] }
 0x30b   :  { %3826 = vmatprep.subr.bf16.mxu1 %v3825_v27  ;;  %v3903_v26 = vpack.c.bf16 %v1431_v25, %v1430_v24  ;;  %v1660_v25 = vld [vmem:[#allocation2 + $0x140] sm:$0xff] }
 0x30e   :  { %3828 = vmatpush3.bf16.msra.mxu1 %v3825_v27  ;;  %v1432_v27 = vld [vmem:[#allocation2 + $0xe0] sm:$0xff] }
 0x30f   :  { %3830 = vmatprep.subr.bf16.mxu1 %v3829_v30  ;;  %v3906_v29 = vpack.c.bf16 %v1433_v28, %v1432_v27  ;;  %v1823_v28 = vld [vmem:[#allocation2 + $0x1c0] sm:$0xff] }
 0x312   :  { %3832 = vmatpush3.bf16.msra.mxu1 %v3829_v30  ;;  %v1434_v30 = vld [vmem:[#allocation2 + $0xf0] sm:$0xff] }
 0x313   :  { %3834 = vmatprep.subr.bf16.mxu1 %v3833_v33  ;;  %v3909_v32 = vpack.c.bf16 %v1435_v31, %v1434_v30  ;;  %v1662_v31 = vld [vmem:[#allocation2 + $0x150] sm:$0xff] }
 0x316   :  { %3836 = vmatpush3.bf16.msra.mxu1 %v3833_v33  ;;  %v1328_v33 = vld [vmem:[#allocation2] sm:$0xff] }
 0x317   :  { %3838 = vmatprep.subr.bf16.mxu1 %v3837_v36  ;;  %v3912_v37 = vpack.c.bf16 %v1329_v34, %v1328_v33  ;;  %v1825_v34 = vld [vmem:[#allocation2 + $0x1d0] sm:$0xff] }
 0x31a   :  { %3840 = vmatpush3.bf16.msra.mxu1 %v3837_v36 }
 0x31b   :  { %3850 = vmatprep.subr.bf16.mxu1 %v3849_v39 }
 0x31d   :  { %3257 = vmatmul.mubr.f32.vlgmr.msra.gmra.mrb[16].mxu1 %v3177_v10  ;;  %v2680_v10 = vld [vmem:[%s4781_s7 + $0x2] sm:$0x3] }
 0x31e   :  { %3852 = vmatpush3.bf16.msra.mxu1 %v3849_v39  ;;  %3302 = vmatprep.mubr.f32.mxu1 %v1139_v13  ;;  %v1423_v13 = vld [vmem:[#allocation2 + $0x98] sm:$0xff] }
 0x31f   :  { %3854 = vmatprep.subr.bf16.mxu1 %v3853_v42  ;;  %v3891_v14 = vpack.c.bf16 %v1423_v13, %v1422_v12  ;;  %v1331_v39 = vld [vmem:[#allocation2 + $0x18] sm:$0xff]  ;;  %v1656_v13 = vld [vmem:[#allocation2 + $0x120] sm:$0xff] }
 0x320   :  { %v1818_v12 = vld [vmem:[#allocation2 + $0x198] sm:$0xff] }
 0x322   :  { %3856 = vmatpush3.bf16.msra.mxu1 %v3853_v42  ;;  %v3915_v42 = vpack.c.bf16 %v1331_v39, %v1330_v38  ;;  %v1665_v38 = vld [vmem:[#allocation2 + $0x168] sm:$0xff] }
 0x323   :  { %3858 = vmatprep.subr.bf16.mxu1 %v3857_v45 }
 0x326   :  { %3860 = vmatpush3.bf16.msra.mxu1 %v3857_v45  ;;  %v3918_v45 = vpack.c.bf16 %v1333_v44, %v1332_v43  ;;  %v1827_v43 = vld [vmem:[#allocation2 + $0x1e0] sm:$0xff] }
 0x327   :  { %3862 = vmatprep.subr.bf16.mxu1 %v3861_v48 }
 0x32a   :  { %3864 = vmatpush3.bf16.msra.mxu1 %v3861_v48  ;;  %v3921_v48 = vpack.c.bf16 %v1335_v47, %v1334_v46  ;;  %v1829_v47 = vld [vmem:[#allocation2 + $0x1f0] sm:$0xff] }
 0x32b   :  { %3866 = vmatprep.subr.bf16.mxu1 %v3865_v51 }
 0x32e   :  { %3868 = vmatpush3.bf16.msra.mxu1 %v3865_v51  ;;  %v3924_v51 = vpack.c.bf16 %v1337_v50, %v1336_v49 }
 0x32f   :  { %3870 = vmatprep.subr.bf16.mxu1 %v3869_v54 }
 0x332   :  { %3872 = vmatpush3.bf16.msra.mxu1 %v3869_v54  ;;  %v3927_v54 = vpack.c.bf16 %v1339_v53, %v1338_v52 }
 0x333   :  { %3874 = vmatprep.subr.bf16.mxu1 %v3873_v57 }
 0x336   :  { %3876 = vmatpush3.bf16.msra.mxu1 %v3873_v57  ;;  %v3930_v57 = vpack.c.bf16 %v1341_v56, %v1340_v55  ;;  %v1978_v56 = vld [vmem:[#allocation2 + $0x200] sm:$0xff] }
 0x337   :  { %3878 = vmatprep.subr.bf16.mxu1 %v3877_v60 }
 0x33a   :  { %3880 = vmatpush3.bf16.msra.mxu1 %v3877_v60  ;;  %v3933_v60 = vpack.c.bf16 %v1343_v59, %v1342_v58  ;;  %v2686_v59 = vld [vmem:[%s4781_s7 + $0x8] sm:$0x3] }
 0x33b   :  { %3938 = vmatprep.subr.bf16.mxu1 %v4167_v61 }
 0x33d   :  { %3303 = vmatmul.mubr.f32.vlgmr.msra.gmra.mrb[16].mxu1 %v4511_v11  ;;  %v3888_v11 = vpack.c.bf16 %v1421_v9, %v1420_v8  ;;  %v1816_v8 = vld [vmem:[#allocation2 + $0x188] sm:$0xff] }
 0x33e   :  { %3428 = vmatprep.mubr.msk.f32.mxu1 %vm4168_vm3, %v4169_v62 }
 0x410   :  { %v3304_v0 = vpop.f32.mrb[16].mxu1 }
 0x411   :  { %v1250_v1 = vadd.f32 %v3304_v0, %v2678_v63  ;;  %v1231_v2 = vpop.f32.mrb[17].mxu1  ;;  %v2684_v0 = vld [vmem:[%s4781_s7 + $0x6] sm:$0x3] }
 0x412   :  { %v1249_v3 = vadd.f32 %v2678_v63, %v1231_v2  ;;  %v2682_v63 = vld [vmem:[%s4781_s7 + $0x4] sm:$0x3]  ;;  %v1653_v2 = vld [vmem:[#allocation2 + $0x108] sm:$0xff] }
 0x413   :  { %v1252_v4 = vmax.f32 %v1250_v1, 0.0  ;;  %v1652_v1 = vld [vmem:[#allocation2 + $0x100] sm:$0xff] }
 0x414   :  { %v1251_v5 = vmax.f32 %v1249_v3, 0.0  ;;  %v1654_v3 = vld [vmem:[#allocation2 + $0x110] sm:$0xff] }
 0x416   :  { %v4613_v6 = vpack.c.bf16 %v1252_v4, %v1251_v5  ;;  %v3939_v4 = vpack.c.bf16 %v1653_v2, %v1652_v1  ;;  %v1655_v5 = vld [vmem:[#allocation2 + $0x118] sm:$0xff]  ;;  %v1980_v2 = vld [vmem:[#allocation2 + $0x210] sm:$0xff] }
 0x418   :  { %3883 = vmatpush3.bf16.msra.mxu0 %v4613_v6  ;;  %3940 = vmatpush3.bf16.msra.mxu1 %v3939_v4 }
 0x419   :  { %3884 = vmatprep.subr.bf16.mxu0 %v4167_v61  ;;  %3941 = vmatprep.subr.bf16.mxu1 %v4167_v61 }
 0x41b   :  { %3310 = vmatmul.mubr.msk.f32.vlgmr.msra.gmra.mrb[6].mxu0 %vm1254_vm4, %v1253_v7  ;;  %v1815_v7 = vld [vmem:[#allocation2 + $0x180] sm:$0xff] }
 0x41c   :  { %3886 = vmatpush3.bf16.msra.mxu0 %v4613_v6  ;;  %3316 = vmatprep.mubr.msk.f32.mxu0 %vm4168_vm3, %v4169_v62  ;;  %v3966_v9 = vpack.c.bf16 %v1816_v8, %v1815_v7 }
 0x41d   :  { %3887 = vmatprep.subr.bf16.mxu0 %v4167_v61 }
 0x41f   :  { %3317 = vmatmul.mubr.msk.f32.vlgmr.msra.gmra.mrb[8].mxu0 %vm1254_vm4, %v2680_v10  ;;  %v1817_v10 = vld [vmem:[#allocation2 + $0x190] sm:$0xff] }
 0x420   :  { %3889 = vmatpush3.bf16.msra.mxu0 %v3888_v11  ;;  %3351 = vmatprep.mubr.msk.f32.mxu0 %vm4168_vm3, %v4169_v62  ;;  %v3942_v11 = vpack.c.bf16 %v1655_v5, %v1654_v3  ;;  %v3969_v15 = vpack.c.bf16 %v1818_v12, %v1817_v10  ;;  %v1981_v3 = vld [vmem:[#allocation2 + $0x218] sm:$0xff]  ;;  %v2688_v5 = vld [vmem:[%s4781_s7 + $0xa] sm:$0x3] }
 0x421   :  { %3890 = vmatprep.subr.bf16.mxu0 %v4167_v61  ;;  %v3996_v8 = vpack.c.bf16 %v1981_v3, %v1980_v2  ;;  %v2144_v10 = vld [vmem:[#allocation2 + $0x298] sm:$0xff]  ;;  %v1983_v12 = vld [vmem:[#allocation2 + $0x228] sm:$0xff] }
 0x422   :  { %3943 = vmatpush3.bf16.msra.mxu1 %v3942_v11  ;;  %v1982_v11 = vld [vmem:[#allocation2 + $0x220] sm:$0xff]  ;;  %v2307_v2 = vld [vmem:[#allocation2 + $0x318] sm:$0xff] }
 0x423   :  { %3944 = vmatprep.subr.bf16.mxu1 %v4167_v61 }
 0x424   :  { %3892 = vmatpush3.bf16.msra.mxu0 %v3891_v14  ;;  %v1657_v14 = vld [vmem:[#allocation2 + $0x128] sm:$0xff] }
 0x425   :  { %3893 = vmatprep.subr.bf16.mxu0 %v4167_v61  ;;  %v3945_v18 = vpack.c.bf16 %v1657_v14, %v1656_v13  ;;  %v3999_v14 = vpack.c.bf16 %v1983_v12, %v1982_v11  ;;  %v2309_v11 = vld [vmem:[#allocation2 + $0x328] sm:$0xff] }
 0x427   :  { %3946 = vmatpush3.bf16.msra.mxu1 %v3945_v18  ;;  %v1985_v18 = vld [vmem:[#allocation2 + $0x238] sm:$0xff] }
 0x428   :  { %3895 = vmatpush3.bf16.msra.mxu0 %v3894_v17  ;;  %v1820_v17 = vld [vmem:[#allocation2 + $0x1a8] sm:$0xff]  ;;  %3947 = vmatprep.subr.bf16.mxu1 %v4167_v61 }
 0x429   :  { %3896 = vmatprep.subr.bf16.mxu0 %v4167_v61  ;;  %v3972_v21 = vpack.c.bf16 %v1820_v17, %v1819_v16  ;;  %v2146_v16 = vld [vmem:[#allocation2 + $0x2a8] sm:$0xff]  ;;  %v1984_v17 = vld [vmem:[#allocation2 + $0x230] sm:$0xff] }
 0x42c   :  { %3898 = vmatpush3.bf16.msra.mxu0 %v3897_v20  ;;  %v1659_v20 = vld [vmem:[#allocation2 + $0x138] sm:$0xff] }
 0x42d   :  { %3899 = vmatprep.subr.bf16.mxu0 %v4167_v61  ;;  %v3948_v24 = vpack.c.bf16 %v1659_v20, %v1658_v19  ;;  %v4002_v20 = vpack.c.bf16 %v1985_v18, %v1984_v17 }
 0x42f   :  { %3949 = vmatpush3.bf16.msra.mxu1 %v3948_v24  ;;  %v1987_v24 = vld [vmem:[#allocation2 + $0x248] sm:$0xff] }
 0x430   :  { %3901 = vmatpush3.bf16.msra.mxu0 %v3900_v23  ;;  %v1822_v23 = vld [vmem:[#allocation2 + $0x1b8] sm:$0xff]  ;;  %3950 = vmatprep.subr.bf16.mxu1 %v4167_v61 }
 0x431   :  { %3902 = vmatprep.subr.bf16.mxu0 %v4167_v61  ;;  %v3975_v27 = vpack.c.bf16 %v1822_v23, %v1821_v22  ;;  %v2148_v22 = vld [vmem:[#allocation2 + $0x2b8] sm:$0xff]  ;;  %v1986_v23 = vld [vmem:[#allocation2 + $0x240] sm:$0xff] }
 0x434   :  { %3904 = vmatpush3.bf16.msra.mxu0 %v3903_v26  ;;  %v1661_v26 = vld [vmem:[#allocation2 + $0x148] sm:$0xff] }
 0x435   :  { %3905 = vmatprep.subr.bf16.mxu0 %v4167_v61  ;;  %v3951_v30 = vpack.c.bf16 %v1661_v26, %v1660_v25  ;;  %v4005_v26 = vpack.c.bf16 %v1987_v24, %v1986_v23  ;;  %v2475_v24 = vld [vmem:[#allocation2 + $0x3c0] sm:$0xff] }
 0x437   :  { %3952 = vmatpush3.bf16.msra.mxu1 %v3951_v30  ;;  %v1989_v30 = vld [vmem:[#allocation2 + $0x258] sm:$0xff] }
 0x438   :  { %3907 = vmatpush3.bf16.msra.mxu0 %v3906_v29  ;;  %v1824_v29 = vld [vmem:[#allocation2 + $0x1c8] sm:$0xff]  ;;  %3953 = vmatprep.subr.bf16.mxu1 %v4167_v61 }
 0x439   :  { %3908 = vmatprep.subr.bf16.mxu0 %v4167_v61  ;;  %v3978_v33 = vpack.c.bf16 %v1824_v29, %v1823_v28  ;;  %v2150_v28 = vld [vmem:[#allocation2 + $0x2c8] sm:$0xff]  ;;  %v1988_v29 = vld [vmem:[#allocation2 + $0x250] sm:$0xff] }
 0x43c   :  { %3910 = vmatpush3.bf16.msra.mxu0 %v3909_v32  ;;  %v1663_v32 = vld [vmem:[#allocation2 + $0x158] sm:$0xff] }
 0x43d   :  { %3911 = vmatprep.subr.bf16.mxu0 %v4167_v61 }
 0x4ee   :  { %v1324_v35 = vpop.f32.mrb[6].mxu0 }
 0x4ef   :  { %v3311_v36 = vpop.f32.mrb[7].mxu0 }
 0x4f0   :  { %v3954_v36 = vpack.c.bf16 %v1663_v32, %v1662_v31  ;;  %v4008_v32 = vpack.c.bf16 %v1989_v30, %v1988_v29  ;;  %v2477_v30 = vld [vmem:[#allocation2 + $0x3d0] sm:$0xff] }
 0x4f2   :  { %v1415_v40 = vpop.f32.mrb[8].mxu0  ;;  %3955 = vmatpush3.bf16.msra.mxu1 %v3954_v36  ;;  %v1991_v36 = vld [vmem:[#allocation2 + $0x268] sm:$0xff] }
 0x4f3   :  { %v3318_v41 = vpop.f32.mrb[9].mxu0  ;;  %3352 = vmatmul.mubr.f32.vlgmr.msra.gmra.mrb[10].mxu0 %v1415_v40  ;;  %3956 = vmatprep.subr.bf16.mxu1 %v4167_v61 }
 0x4f4   :  { %3913 = vmatpush3.bf16.msra.mxu0 %v3912_v37  ;;  %3386 = vmatprep.mubr.msk.f32.mxu0 %vm4168_vm3, %v4169_v62  ;;  %v1664_v37 = vld [vmem:[#allocation2 + $0x160] sm:$0xff]  ;;  %v1666_v41 = vld [vmem:[#allocation2 + $0x170] sm:$0xff] }
 0x4f5   :  { %3914 = vmatprep.subr.bf16.mxu0 %v4167_v61  ;;  %v3957_v40 = vpack.c.bf16 %v1665_v38, %v1664_v37 }
 0x4f7   :  { %3958 = vmatpush3.bf16.msra.mxu1 %v3957_v40  ;;  %v1993_v40 = vld [vmem:[#allocation2 + $0x278] sm:$0xff] }
 0x4f8   :  { %3916 = vmatpush3.bf16.msra.mxu0 %v3915_v42  ;;  %3959 = vmatprep.subr.bf16.mxu1 %v4167_v61  ;;  %v1667_v42 = vld [vmem:[#allocation2 + $0x178] sm:$0xff] }
 0x4f9   :  { %3917 = vmatprep.subr.bf16.mxu0 %v4167_v61  ;;  %v3960_v44 = vpack.c.bf16 %v1667_v42, %v1666_v41  ;;  %v2153_v41 = vld [vmem:[#allocation2 + $0x2e0] sm:$0xff] }
 0x4fb   :  { %3961 = vmatpush3.bf16.msra.mxu1 %v3960_v44 }
 0x4fc   :  { %3919 = vmatpush3.bf16.msra.mxu0 %v3918_v45  ;;  %v1828_v45 = vld [vmem:[#allocation2 + $0x1e8] sm:$0xff]  ;;  %3989 = vmatprep.subr.bf16.mxu1 %v4167_v61 }
 0x4fd   :  { %3920 = vmatprep.subr.bf16.mxu0 %v4167_v61  ;;  %v3984_v46 = vpack.c.bf16 %v1828_v45, %v1827_v43  ;;  %v2154_v43 = vld [vmem:[#allocation2 + $0x2e8] sm:$0xff]  ;;  %v2155_v45 = vld [vmem:[#allocation2 + $0x2f0] sm:$0xff] }
 0x4fe   :  { %v4038_v44 = vpack.c.bf16 %v2154_v43, %v2153_v41  ;;  %v2482_v43 = vld [vmem:[#allocation2 + $0x3f8] sm:$0xff] }
 0x500   :  { %3922 = vmatpush3.bf16.msra.mxu0 %v3921_v48  ;;  %v1830_v48 = vld [vmem:[#allocation2 + $0x1f8] sm:$0xff] }
 0x501   :  { %3923 = vmatprep.subr.bf16.mxu0 %v4167_v61  ;;  %v3987_v49 = vpack.c.bf16 %v1830_v48, %v1829_v47 }
 0x504   :  { %3925 = vmatpush3.bf16.msra.mxu0 %v3924_v51 }
 0x505   :  { %3926 = vmatprep.subr.bf16.mxu0 %v4167_v61 }
 0x508   :  { %3928 = vmatpush3.bf16.msra.mxu0 %v3927_v54 }
 0x509   :  { %3929 = vmatprep.subr.bf16.mxu0 %v4167_v61 }
 0x50c   :  { %3931 = vmatpush3.bf16.msra.mxu0 %v3930_v57  ;;  %v1979_v57 = vld [vmem:[#allocation2 + $0x208] sm:$0xff] }
 0x50d   :  { %3932 = vmatprep.subr.bf16.mxu0 %v4167_v61 }
 0x510   :  { %3934 = vmatpush3.bf16.msra.mxu0 %v3933_v60  ;;  %v3993_v60 = vpack.c.bf16 %v1979_v57, %v1978_v56 }
 0x511   :  { %3935 = vmatprep.subr.bf16.mxu0 %v4167_v61 }
 0x513   :  { %3387 = vmatmul.mubr.f32.vlgmr.msra.gmra.mrb[12].mxu0 %v1324_v35  ;;  %v1826_v35 = vld [vmem:[#allocation2 + $0x1d8] sm:$0xff] }
 0x514   :  { %3937 = vmatpush3.bf16.msra.mxu0 %v4613_v6  ;;  %3393 = vmatprep.mubr.msk.f32.mxu0 %vm4168_vm3, %v4169_v62  ;;  %v3981_v39 = vpack.c.bf16 %v1826_v35, %v1825_v34  ;;  %v2152_v34 = vld [vmem:[#allocation2 + $0x2d8] sm:$0xff]  ;;  %v1990_v35 = vld [vmem:[#allocation2 + $0x260] sm:$0xff] }
 0x515   :  { %3962 = vmatprep.subr.bf16.mxu0 %v4167_v61  ;;  %v4011_v38 = vpack.c.bf16 %v1991_v36, %v1990_v35  ;;  %v2318_v36 = vld [vmem:[#allocation2 + $0x370] sm:$0xff] }
 0x517   :  { %3394 = vmatmul.mubr.msk.f32.vlgmr.msra.gmra.mrb[14].mxu0 %vm1254_vm4, %v2682_v63  ;;  %v2141_v63 = vld [vmem:[#allocation2 + $0x280] sm:$0xff] }
 0x518   :  { %3964 = vmatpush3.bf16.msra.mxu0 %v4613_v6  ;;  %3435 = vmatprep.mubr.msk.f32.mxu0 %vm4168_vm3, %v4169_v62 }
 0x519   :  { %3965 = vmatprep.subr.bf16.mxu0 %v4167_v61 }
 0x51b   :  { %3436 = vmatmul.mubr.msk.f32.vlgmr.msra.gmra.mrb[16].mxu0 %vm1254_vm4, %v2684_v0  ;;  %v2142_v0 = vld [vmem:[#allocation2 + $0x288] sm:$0xff] }
 0x51c   :  { %3470 = vmatprep.mubr.msk.f32.mxu0 %vm4168_vm3, %v4169_v62  ;;  %3967 = vmatpush3.bf16.msra.mxu0 %v3966_v9  ;;  %v4020_v7 = vpack.c.bf16 %v2142_v0, %v2141_v63  ;;  %v2143_v9 = vld [vmem:[#allocation2 + $0x290] sm:$0xff]  ;;  %v2468_v63 = vld [vmem:[#allocation2 + $0x388] sm:$0xff] }
 0x51d   :  { %3968 = vmatprep.subr.bf16.mxu0 %v4167_v61  ;;  %v4023_v13 = vpack.c.bf16 %v2144_v10, %v2143_v9  ;;  %v2470_v9 = vld [vmem:[#allocation2 + $0x398] sm:$0xff]  ;;  %v2308_v10 = vld [vmem:[#allocation2 + $0x320] sm:$0xff] }
 0x51e   :  { %v4053_v12 = vpack.c.bf16 %v2309_v11, %v2308_v10 }
 0x520   :  { %3970 = vmatpush3.bf16.msra.mxu0 %v3969_v15  ;;  %v2145_v15 = vld [vmem:[#allocation2 + $0x2a0] sm:$0xff] }
 0x521   :  { %3971 = vmatprep.subr.bf16.mxu0 %v4167_v61  ;;  %v4026_v19 = vpack.c.bf16 %v2146_v16, %v2145_v15  ;;  %v2310_v15 = vld [vmem:[#allocation2 + $0x330] sm:$0xff]  ;;  %v2311_v16 = vld [vmem:[#allocation2 + $0x338] sm:$0xff] }
 0x522   :  { %v4056_v18 = vpack.c.bf16 %v2311_v16, %v2310_v15 }
 0x524   :  { %3973 = vmatpush3.bf16.msra.mxu0 %v3972_v21  ;;  %v2147_v21 = vld [vmem:[#allocation2 + $0x2b0] sm:$0xff] }
 0x525   :  { %3974 = vmatprep.subr.bf16.mxu0 %v4167_v61  ;;  %v4029_v25 = vpack.c.bf16 %v2148_v22, %v2147_v21  ;;  %v2313_v21 = vld [vmem:[#allocation2 + $0x348] sm:$0xff] }
 0x528   :  { %3976 = vmatpush3.bf16.msra.mxu0 %v3975_v27  ;;  %v2149_v27 = vld [vmem:[#allocation2 + $0x2c0] sm:$0xff] }
 0x529   :  { %3977 = vmatprep.subr.bf16.mxu0 %v4167_v61  ;;  %v4032_v31 = vpack.c.bf16 %v2150_v28, %v2149_v27  ;;  %v2315_v27 = vld [vmem:[#allocation2 + $0x358] sm:$0xff] }
 0x52c   :  { %3979 = vmatpush3.bf16.msra.mxu0 %v3978_v33  ;;  %v2151_v33 = vld [vmem:[#allocation2 + $0x2d0] sm:$0xff] }
 0x52d   :  { %3980 = vmatprep.subr.bf16.mxu0 %v4167_v61  ;;  %v4035_v37 = vpack.c.bf16 %v2152_v34, %v2151_v33  ;;  %v2317_v33 = vld [vmem:[#allocation2 + $0x368] sm:$0xff] }
 0x530   :  { %3982 = vmatpush3.bf16.msra.mxu0 %v3981_v39  ;;  %v1992_v39 = vld [vmem:[#allocation2 + $0x270] sm:$0xff] }
 0x531   :  { %3983 = vmatprep.subr.bf16.mxu0 %v4167_v61  ;;  %v4014_v42 = vpack.c.bf16 %v1993_v40, %v1992_v39  ;;  %v2480_v40 = vld [vmem:[#allocation2 + $0x3e8] sm:$0xff] }
 0x534   :  { %3985 = vmatpush3.bf16.msra.mxu0 %v3984_v46  ;;  %v2156_v46 = vld [vmem:[#allocation2 + $0x2f8] sm:$0xff] }
 0x535   :  { %3986 = vmatprep.subr.bf16.mxu0 %v4167_v61  ;;  %v4041_v47 = vpack.c.bf16 %v2156_v46, %v2155_v45 }
 0x538   :  { %3988 = vmatpush3.bf16.msra.mxu0 %v3987_v49 }
 0x539   :  { %4016 = vmatprep.subr.bf16.mxu0 %v4167_v61 }
 0x5c6   :  { %v1502_v50 = vpop.f32.mrb[10].mxu0 }
 0x5c7   :  { %v3353_v51 = vpop.f32.mrb[11].mxu0 }
 0x5e6   :  { %v1572_v52 = vpop.f32.mrb[12].mxu0 }
 0x5e7   :  { %v4683_v53 = vadd.f32 %v1572_v52, %v1502_v50  ;;  %v3388_v54 = vpop.f32.mrb[13].mxu0 }
 0x5e8   :  { %v2304_v54 = vld [vmem:[#allocation2 + $0x300] sm:$0xff] }
 0x5ea   :  { %v1647_v55 = vpop.f32.mrb[14].mxu0 }
 0x5eb   :  { %v3395_v58 = vpop.f32.mrb[15].mxu0  ;;  %3429 = vmatmul.mubr.f32.vlgmr.msra.gmra.mrb[18].mxu1 %v1647_v55  ;;  %v2305_v55 = vld [vmem:[#allocation2 + $0x308] sm:$0xff] }
 0x5ec   :  { %3991 = vmatpush3.bf16.msra.mxu1 %v4613_v6  ;;  %3477 = vmatprep.mubr.msk.f32.mxu1 %vm4168_vm3, %v4169_v62 }
 0x5ed   :  { %3992 = vmatprep.subr.bf16.mxu1 %v4167_v61 }
 0x5ee   :  { %v1810_v1 = vpop.f32.mrb[16].mxu0 }
 0x5ef   :  { %v3437_v4 = vpop.f32.mrb[17].mxu0  ;;  %3471 = vmatmul.mubr.f32.vlgmr.msra.gmra.mrb[18].mxu0 %v1810_v1  ;;  %3478 = vmatmul.mubr.msk.f32.vlgmr.msra.gmra.mrb[20].mxu1 %vm1254_vm4, %v2686_v59  ;;  %v2690_v59 = vld [vmem:[%s4781_s7 + $0xc] sm:$0x3]  ;;  %v2306_v1 = vld [vmem:[#allocation2 + $0x310] sm:$0xff] }
 0x5f0   :  { %4018 = vmatpush3.bf16.msra.mxu0 %v4613_v6  ;;  %3519 = vmatprep.mubr.msk.f32.mxu0 %vm4168_vm3, %v4169_v62  ;;  %v2692_v4 = vld [vmem:[%s4781_s7 + $0xe] sm:$0x3] }
 0x5f1   :  { %3994 = vmatpush3.bf16.msra.mxu1 %v3993_v60  ;;  %4019 = vmatprep.subr.bf16.mxu0 %v4167_v61  ;;  %v2467_v60 = vld [vmem:[#allocation2 + $0x380] sm:$0xff] }
 0x5f2   :  { %3995 = vmatprep.subr.bf16.mxu1 %v4167_v61  ;;  %3512 = vmatprep.mubr.msk.f32.mxu1 %vm4168_vm3, %v4169_v62 }
 0x5f3   :  { %3520 = vmatmul.mubr.msk.f32.vlgmr.msra.gmra.mrb[20].mxu0 %vm1254_vm4, %v2688_v5  ;;  %v4074_v5 = vpack.c.bf16 %v2468_v63, %v2467_v60 }
 0x5f4   :  { %4021 = vmatpush3.bf16.msra.mxu0 %v4020_v7  ;;  %3554 = vmatprep.mubr.msk.f32.mxu0 %vm4168_vm3, %v4169_v62  ;;  %v4050_v7 = vpack.c.bf16 %v2307_v2, %v2306_v1 }
 0x5f5   :  { %3997 = vmatpush3.bf16.msra.mxu1 %v3996_v8  ;;  %4022 = vmatprep.subr.bf16.mxu0 %v4167_v61  ;;  %v2469_v8 = vld [vmem:[#allocation2 + $0x390] sm:$0xff] }
 0x5f6   :  { %3998 = vmatprep.subr.bf16.mxu1 %v4167_v61 }
 0x5f8   :  { %4024 = vmatpush3.bf16.msra.mxu0 %v4023_v13  ;;  %v2471_v13 = vld [vmem:[#allocation2 + $0x3a0] sm:$0xff] }
 0x5f9   :  { %4000 = vmatpush3.bf16.msra.mxu1 %v3999_v14  ;;  %4025 = vmatprep.subr.bf16.mxu0 %v4167_v61  ;;  %v2472_v14 = vld [vmem:[#allocation2 + $0x3a8] sm:$0xff] }
 0x5fa   :  { %4001 = vmatprep.subr.bf16.mxu1 %v4167_v61  ;;  %v4080_v17 = vpack.c.bf16 %v2472_v14, %v2471_v13 }
 0x5fc   :  { %4027 = vmatpush3.bf16.msra.mxu0 %v4026_v19  ;;  %v2473_v19 = vld [vmem:[#allocation2 + $0x3b0] sm:$0xff] }
 0x5fd   :  { %4003 = vmatpush3.bf16.msra.mxu1 %v4002_v20  ;;  %4028 = vmatprep.subr.bf16.mxu0 %v4167_v61  ;;  %v2474_v20 = vld [vmem:[#allocation2 + $0x3b8] sm:$0xff] }
 0x5fe   :  { %4004 = vmatprep.subr.bf16.mxu1 %v4167_v61  ;;  %v4083_v22 = vpack.c.bf16 %v2474_v20, %v2473_v19 }
 0x600   :  { %4030 = vmatpush3.bf16.msra.mxu0 %v4029_v25  ;;  %v2476_v25 = vld [vmem:[#allocation2 + $0x3c8] sm:$0xff] }
 0x601   :  { %4006 = vmatpush3.bf16.msra.mxu1 %v4005_v26  ;;  %4031 = vmatprep.subr.bf16.mxu0 %v4167_v61  ;;  %v2314_v26 = vld [vmem:[#allocation2 + $0x350] sm:$0xff]  ;;  %v4086_v28 = vpack.c.bf16 %v2476_v25, %v2475_v24 }
 0x602   :  { %4007 = vmatprep.subr.bf16.mxu1 %v4167_v61  ;;  %v4062_v29 = vpack.c.bf16 %v2315_v27, %v2314_v26 }
 0x604   :  { %4033 = vmatpush3.bf16.msra.mxu0 %v4032_v31  ;;  %v2478_v31 = vld [vmem:[#allocation2 + $0x3d8] sm:$0xff] }
 0x605   :  { %4009 = vmatpush3.bf16.msra.mxu1 %v4008_v32  ;;  %4034 = vmatprep.subr.bf16.mxu0 %v4167_v61  ;;  %v2316_v32 = vld [vmem:[#allocation2 + $0x360] sm:$0xff]  ;;  %v4089_v34 = vpack.c.bf16 %v2478_v31, %v2477_v30 }
 0x606   :  { %4010 = vmatprep.subr.bf16.mxu1 %v4167_v61  ;;  %v4065_v35 = vpack.c.bf16 %v2317_v33, %v2316_v32 }
 0x608   :  { %4036 = vmatpush3.bf16.msra.mxu0 %v4035_v37  ;;  %v2319_v37 = vld [vmem:[#allocation2 + $0x378] sm:$0xff] }
 0x609   :  { %4012 = vmatpush3.bf16.msra.mxu1 %v4011_v38  ;;  %4037 = vmatprep.subr.bf16.mxu0 %v4167_v61  ;;  %v2479_v38 = vld [vmem:[#allocation2 + $0x3e0] sm:$0xff]  ;;  %v4068_v39 = vpack.c.bf16 %v2319_v37, %v2318_v36 }
 0x60a   :  { %4013 = vmatprep.subr.bf16.mxu1 %v4167_v61  ;;  %v4092_v41 = vpack.c.bf16 %v2480_v40, %v2479_v38 }
 0x60c   :  { %4039 = vmatpush3.bf16.msra.mxu0 %v4038_v44 }
 0x60d   :  { %4015 = vmatpush3.bf16.msra.mxu1 %v4014_v42  ;;  %4040 = vmatprep.subr.bf16.mxu0 %v4167_v61  ;;  %v2481_v42 = vld [vmem:[#allocation2 + $0x3f0] sm:$0xff] }
 0x60e   :  { %4043 = vmatprep.subr.bf16.mxu1 %v4167_v61  ;;  %v4095_v44 = vpack.c.bf16 %v2482_v43, %v2481_v42 }
 0x610   :  { %4042 = vmatpush3.bf16.msra.mxu0 %v4041_v47 }
 0x611   :  { %4070 = vmatprep.subr.bf16.mxu0 %v4167_v61 }
 0x6be   :  { %v1734_v48 = vpop.f32.mrb[18].mxu1 }
 0x6bf   :  { %v1738_v49 = vadd.f32 %v1734_v48, %v4683_v53  ;;  %v3430_v50 = vpop.f32.mrb[19].mxu1  ;;  %v4047_v53 = vpack.c.bf16 %v2305_v55, %v2304_v54 }
 0x6c2   :  { %v1897_v51 = vpop.f32.mrb[18].mxu0  ;;  %v1973_v52 = vpop.f32.mrb[20].mxu1 }
 0x6c3   :  { %v4722_v56 = vadd.f32 %v1897_v51, %v1738_v49  ;;  %v3472_v57 = vpop.f32.mrb[19].mxu0  ;;  %3513 = vmatmul.mubr.f32.vlgmr.msra.gmra.mrb[22].mxu1 %v1973_v52  ;;  %v3479_v58 = vpop.f32.mrb[21].mxu1 }
 0x6c4   :  { %4045 = vmatpush3.bf16.msra.mxu1 %v4613_v6  ;;  %3561 = vmatprep.mubr.msk.f32.mxu1 %vm4168_vm3, %v4169_v62 }
 0x6c5   :  { %4046 = vmatprep.subr.bf16.mxu1 %v4167_v61 }
 0x6c6   :  { %v2136_v0 = vpop.f32.mrb[20].mxu0 }
 0x6c7   :  { %v3521_v3 = vpop.f32.mrb[21].mxu0  ;;  %3555 = vmatmul.mubr.f32.vlgmr.msra.gmra.mrb[22].mxu0 %v2136_v0  ;;  %3562 = vmatmul.mubr.msk.f32.vlgmr.msra.gmra.mrb[24].mxu1 %vm1254_vm4, %v2690_v59 }
 0x6c8   :  { %4072 = vmatpush3.bf16.msra.mxu0 %v4613_v6  ;;  %3603 = vmatprep.mubr.msk.f32.mxu0 %vm4168_vm3, %v4169_v62  ;;  %v4077_v6 = vpack.c.bf16 %v2470_v9, %v2469_v8 }
 0x6c9   :  { %4048 = vmatpush3.bf16.msra.mxu1 %v4047_v53  ;;  %4073 = vmatprep.subr.bf16.mxu0 %v4167_v61 }
 0x6ca   :  { %4049 = vmatprep.subr.bf16.mxu1 %v4167_v61  ;;  %3596 = vmatprep.mubr.msk.f32.mxu1 %vm4168_vm3, %v4169_v62 }
 0x6cb   :  { %3604 = vmatmul.mubr.msk.f32.vlgmr.msra.gmra.mrb[24].mxu0 %vm1254_vm4, %v2692_v4 }
 0x6cc   :  { %4075 = vmatpush3.bf16.msra.mxu0 %v4074_v5  ;;  %3638 = vmatprep.mubr.msk.f32.mxu0 %vm4168_vm3, %v4169_v62  ;;  %v2312_v62 = vld [vmem:[#allocation2 + $0x340] sm:$0xff] }
 0x6cd   :  { %4051 = vmatpush3.bf16.msra.mxu1 %v4050_v7  ;;  %4076 = vmatprep.subr.bf16.mxu0 %v4167_v61  ;;  %v4059_v23 = vpack.c.bf16 %v2313_v21, %v2312_v62 }
 0x6ce   :  { %4052 = vmatprep.subr.bf16.mxu1 %v4167_v61 }
 0x6d0   :  { %4078 = vmatpush3.bf16.msra.mxu0 %v4077_v6 }
 0x6d1   :  { %4054 = vmatpush3.bf16.msra.mxu1 %v4053_v12  ;;  %4079 = vmatprep.subr.bf16.mxu0 %v4167_v61 }
 0x6d2   :  { %4055 = vmatprep.subr.bf16.mxu1 %v4167_v61 }
 0x6d4   :  { %4081 = vmatpush3.bf16.msra.mxu0 %v4080_v17 }
 0x6d5   :  { %4057 = vmatpush3.bf16.msra.mxu1 %v4056_v18  ;;  %4082 = vmatprep.subr.bf16.mxu0 %v4167_v61 }
 0x6d6   :  { %4058 = vmatprep.subr.bf16.mxu1 %v4167_v61 }
 0x6d8   :  { %4084 = vmatpush3.bf16.msra.mxu0 %v4083_v22 }
 0x6d9   :  { %4060 = vmatpush3.bf16.msra.mxu1 %v4059_v23  ;;  %4085 = vmatprep.subr.bf16.mxu0 %v4167_v61 }
 0x6da   :  { %4061 = vmatprep.subr.bf16.mxu1 %v4167_v61 }
 0x6dc   :  { %4087 = vmatpush3.bf16.msra.mxu0 %v4086_v28 }
 0x6dd   :  { %4063 = vmatpush3.bf16.msra.mxu1 %v4062_v29  ;;  %4088 = vmatprep.subr.bf16.mxu0 %v4167_v61 }
 0x6de   :  { %4064 = vmatprep.subr.bf16.mxu1 %v4167_v61 }
 0x6e0   :  { %4090 = vmatpush3.bf16.msra.mxu0 %v4089_v34 }
 0x6e1   :  { %4066 = vmatpush3.bf16.msra.mxu1 %v4065_v35  ;;  %4091 = vmatprep.subr.bf16.mxu0 %v4167_v61 }
 0x6e2   :  { %4067 = vmatprep.subr.bf16.mxu1 %v4167_v61 }
 0x6e4   :  { %4093 = vmatpush3.bf16.msra.mxu0 %v4092_v41 }
 0x6e5   :  { %4069 = vmatpush3.bf16.msra.mxu1 %v4068_v39  ;;  %4094 = vmatprep.subr.bf16.mxu0 %v4167_v61  ;;  %v2694_v61 = vld [vmem:[%s4783_s9] ss:$0 sm:$0xff] }
 0x6e8   :  { %4096 = vmatpush3.bf16.msra.mxu0 %v4095_v44 }
 0x796   :  { %v2060_v45 = vpop.f32.mrb[22].mxu1 }
 0x797   :  { %v2064_v46 = vadd.f32 %v2060_v45, %v4722_v56  ;;  %v3514_v47 = vpop.f32.mrb[23].mxu1 }
 0x79a   :  { %v2223_v48 = vpop.f32.mrb[22].mxu0  ;;  %v2299_v49 = vpop.f32.mrb[24].mxu1 }
 0x79b   :  { %v2227_v50 = vadd.f32 %v2223_v48, %v2064_v46  ;;  %v3556_v51 = vpop.f32.mrb[23].mxu0  ;;  %3597 = vmatmul.mubr.f32.vlgmr.msra.gmra.mrb[26].mxu1 %v2299_v49  ;;  %v3563_v52 = vpop.f32.mrb[25].mxu1 }
 0x79e   :  { %v2462_v54 = vpop.f32.mrb[24].mxu0 }
 0x79f   :  { %v3605_v55 = vpop.f32.mrb[25].mxu0  ;;  %3639 = vmatmul.mubr.f32.vlgmr.msra.gmra.mrb[26].mxu0 %v2462_v54 }
 0x86e   :  { %v2386_v57 = vpop.f32.mrb[26].mxu1 }
 0x86f   :  { %v2390_v58 = vadd.f32 %v2386_v57, %v2227_v50  ;;  %v3598_v59 = vpop.f32.mrb[27].mxu1 }
 0x872   :  { %v2549_v53 = vpop.f32.mrb[26].mxu0 }
 0x873   :  { %v2553_v56 = vadd.f32 %v2549_v53, %v2390_v58  ;;  %v3640_v60 = vpop.f32.mrb[27].mxu0 }
 0x875   :  { %v2561_v63 = vadd.f32 %v2694_v61, %v2553_v56 }
 0x877   :  { %2563 = vst.msk [vmem:[#allocation5] sm:$0x3] %vm2562_vm5, %v2561_v63 }
 0x878   :  { %4149 = shalt.err (!%p4146_p12)
}
 0x879   :  { %s4150_s4 = scalar_lea.hbm %s4784_s10, 32 }
 0x87a   :  { %p4151_p13 = scmp.ne.s32.totalorder %s4784_s10, %s4150_s4  ;;  %p4154_p0 = scmp.lt.u32.totalorder %s4150_s4, %s4784_s10 }
 0x87c   :  { %p4156_p1 = pnand %p4154_p0, %p4151_p13 }
 0x87e   :  { %4159 = shalt.err (!%p4156_p1)
}
 0x87f   :  { %2573 = dma.vmem_to_hbm [thread:$0]  %s2571_s26, 32, %s4784_s10, [#allocation4]  }
 0x880   :  { %4162 = dma.done.wait [#allocation4], 32  }
 0x881   :  { %4163 = vsyncadd [#allocation4], 4294967264 }
 0x882   :  { %2577 = vsyncpa [#allocation3], 1 }
 0x883   :  { %2578 = vsyncpa [#allocation4], 1 }

</bundles_post_ra>
